<compile_context>
chip_gen: v5e
topology: v5e:2x2
jax: 0.10.0
libtpu: 0.0.40
codegen_flags: <defaults>
</compile_context>

<pallas_src>
import functools

import jax
import jax.numpy as jnp
from jax.experimental import pallas as pl
from jax.experimental.pallas import tpu as pltpu


def _round_up(x, m):
    return (x + m - 1) // m * m


def _cdiv(a, b):
    return (a + b - 1) // b


def _cross_graph_attention_kernel(car_ref, infra_ref,
                                  wcar_ref, bcar_ref,
                                  winf_ref, binf_ref,
                                  whh_ref, bhh_ref,
                                  s_ref, r_ref,
                                  out_ref, *, e_pad, head_scale):
    cdt = wcar_ref.dtype          # compute dtype for MXU matmuls (bf16 by default)

    car = car_ref[...]
    infra = infra_ref[...]

    # Fused projections (one wide MXU matmul per side), f32 accumulation.
    #   car3 = car   @ [Wq | Wih | Wself] + [bq | bih | bself]   -> (TN, 3*Ep)
    #   inf2 = infra @ [Wk | Wv]          + [bk | bv]            -> (TN, 2*Ep)
    # Biases are f32 rows added to the f32 accumulator.
    car3 = jnp.dot(car, wcar_ref[...], preferred_element_type=jnp.float32) + bcar_ref[...]
    inf2 = jnp.dot(infra, winf_ref[...], preferred_element_type=jnp.float32) + binf_ref[...]

    q = car3[:, :e_pad]
    gate_ih = car3[:, e_pad:2 * e_pad]
    self_proj = car3[:, 2 * e_pad:]
    k = inf2[:, :e_pad]
    v = inf2[:, e_pad:]

    # Per-head reduce via a 0/1 block-diagonal segment matrix on the MXU (bf16
    # is exact for S); the 1/sqrt(Dh) scale is applied in f32 afterwards.
    qk = (q * k).astype(cdt)
    alpha = jnp.dot(qk, s_ref[...], preferred_element_type=jnp.float32) * head_scale   # (TN, H)

    # Softmax over the head dimension (PyTorch nn.Softmax(dim=1)), all f32.
    alpha = alpha - jnp.max(alpha, axis=-1, keepdims=True)
    ea = jnp.exp(alpha)
    denom = jnp.sum(ea, axis=-1, keepdims=True)
    inv = pl.reciprocal(denom, approx=True)      # EUP slot
    inv = inv * (2.0 - denom * inv)              # one Newton step -> ~f32 accurate (not bit-exact /)
    alpha = (ea * inv).astype(cdt)
    # TODO(synk): nn.Dropout(attn_drop) is identity in eval mode; omitted here.

    # Broadcast the per-head weights back to E lanes (0/1 matrix R, exact in bf16).
    alpha_e = jnp.dot(alpha, r_ref[...], preferred_element_type=jnp.float32)           # (TN, Ep)
    infra_att = v * alpha_e

    gate = jax.nn.sigmoid(
        gate_ih
        + jnp.dot(infra_att.astype(cdt), whh_ref[...], preferred_element_type=jnp.float32)
        + bhh_ref[...])
    # Fused blend: gate*self + (1-gate)*att  ==  att + gate*(self - att)
    out_ref[...] = (infra_att + gate * (self_proj - infra_att)).astype(out_ref.dtype)


def _pack_params(params, E, num_heads, compute_dtype):
    """Pad to 128-lane-aligned E, fuse the six projections into two wide weight
    matrices (compute dtype), keep biases in f32, and build 0/1 per-head
    segment matrices S:(Ep,H) / R:(H,Ep)."""
    E_p = _round_up(E, 128)
    Dh = E // num_heads

    def pad_w(w):                                   # (E, E) -> (E_p, E_p), compute dtype
        w = jnp.asarray(w, jnp.float32).astype(compute_dtype)
        return jnp.zeros((E_p, E_p), compute_dtype).at[:E, :E].set(w)

    def pad_b(b):                                   # (1, E) -> (1, E_p), f32 (accuracy: added to f32 acc)
        b = jnp.asarray(b, jnp.float32)
        return jnp.zeros((1, E_p), jnp.float32).at[:, :E].set(b)

    wcar = jnp.concatenate([pad_w(params["wq"]), pad_w(params["wih"]),
                            pad_w(params["wself"])], axis=1)                     # (E_p, 3E_p)
    bcar = jnp.concatenate([pad_b(params["bq"]), pad_b(params["bih"]),
                            pad_b(params["bself"])], axis=1)                     # (1, 3E_p)
    winf = jnp.concatenate([pad_w(params["wk"]), pad_w(params["wv"])], axis=1)   # (E_p, 2E_p)
    binf = jnp.concatenate([pad_b(params["bk"]), pad_b(params["bv"])], axis=1)   # (1, 2E_p)
    whh = pad_w(params["whh"])
    bhh = pad_b(params["bhh"])

    head_id = jnp.arange(E) // Dh
    seg = (head_id[:, None] == jnp.arange(num_heads)[None, :]).astype(jnp.float32)
    S = jnp.zeros((E_p, num_heads), compute_dtype).at[:E, :].set(seg.astype(compute_dtype))
    R = jnp.zeros((num_heads, E_p), compute_dtype).at[:, :E].set(seg.T.astype(compute_dtype))

    return E_p, Dh, (wcar, bcar, winf, binf, whh, bhh, S, R)


def cross_graph_attention(car_feat, infra_feat, params, *, num_heads,
                          block_rows=1024, compute_dtype=jnp.bfloat16):
    """params: dict with 'wq','bq','wk','bk','wv','bv','wself','bself',
    'wih','bih','whh','bhh'.  Weights already (E_in, E_out) (= torch weight.T);
    biases are (1, E) rows."""
    N, E = car_feat.shape
    assert infra_feat.shape == (N, E), "car/infra must share the (N, E) shape"
    out_dtype = car_feat.dtype
    compute_dtype = jnp.dtype(compute_dtype)

    E_p, Dh, packed = _pack_params(params, E, num_heads, compute_dtype)
    head_scale = 1.0 / float(Dh) ** 0.5

    # ---------------- tiling / VMEM policy ----------------
    act_itemsize = compute_dtype.itemsize
    sublane = max(8, 32 // act_itemsize)             # 8 (f32) / 16 (bf16)

    try:                                             # 128 MiB v5e/v6e, 64 MiB v7x
        vmem_cap = int(pltpu.get_tpu_info().vmem_capacity_bytes)
    except Exception:
        vmem_cap = 64 << 20                          # safe floor on every chip

    wbytes = sum(int(a.size) * a.dtype.itemsize for a in packed)
    # Per-row VMEM: double-buffered bf16 in-tiles + out tile + f32 intermediates
    # (car3/inf2/att/gate/...) ~= 64 bytes per (row, padded lane).
    per_row = 64 * E_p
    reserve = 8 << 20
    budget = max(vmem_cap - reserve - 2 * wbytes, 4 << 20)   # 2x: worst case weights double-buffered
    tn_cap = int(min(block_rows, budget // per_row))
    tn_cap = max(sublane, (tn_cap // sublane) * sublane)

    # >=2 grid steps when there is enough work (keeps both v7x TensorCores busy)
    # and pick TN so row padding stays small for awkward N.
    min_steps = 2 if N > sublane else 1
    steps = max(min_steps, _cdiv(N, tn_cap))
    TN = _round_up(_cdiv(N, steps), sublane)
    N_p = TN * steps

    vmem_limit = int(min(vmem_cap, max(32 << 20, 2 * wbytes + TN * per_row + reserve)))

    # ---------------- pad & cast activations ----------------
    def pad_act(x):
        x = x.astype(compute_dtype)
        if N_p == N and E_p == E:
            return x
        return jnp.zeros((N_p, E_p), compute_dtype).at[:N, :E].set(x)

    car_p = pad_act(car_feat)
    infra_p = pad_act(infra_feat)

    row_spec = pl.BlockSpec((TN, E_p), lambda i: (i, 0))
    kernel = functools.partial(_cross_graph_attention_kernel,
                               e_pad=E_p, head_scale=head_scale)

    def _run(single_buffer_weights):
        if single_buffer_weights:
            # Weights/biases/S/R never change across the grid: keep a single
            # resident copy instead of the default double buffer.
            def resident(shape):
                return pl.BlockSpec(shape, lambda i: (0, 0), pipeline_mode=pl.Buffered(1))
        else:
            def resident(shape):
                return pl.BlockSpec(shape, lambda i: (0, 0))

        in_specs = [
            row_spec,                        # car tile
            row_spec,                        # infra tile
            resident((E_p, 3 * E_p)),        # Wcar = [Wq | Wih | Wself]
            resident((1, 3 * E_p)),          # bcar (f32)
            resident((E_p, 2 * E_p)),        # Winf = [Wk | Wv]
            resident((1, 2 * E_p)),          # binf (f32)
            resident((E_p, E_p)),            # Whh
            resident((1, E_p)),              # bhh (f32)
            resident((E_p, num_heads)),      # S
            resident((num_heads, E_p)),      # R
        ]
        return pl.pallas_call(
            kernel,
            out_shape=jax.ShapeDtypeStruct((N_p, E_p), out_dtype),
            grid=(steps,),
            in_specs=in_specs,
            out_specs=row_spec,
            compiler_params=pltpu.CompilerParams(
                dimension_semantics=("parallel",),
                vmem_limit_bytes=vmem_limit),
        )(car_p, infra_p, *packed)

    try:
        out_p = _run(True)
    except Exception:
        # pl.Buffered(1) not supported by this jax/libtpu build: fall back to the
        # default double-buffered resident weights (correctness unaffected).
        out_p = _run(False)

    if N_p == N and E_p == E:
        return out_p
    return out_p[:N, :E]


def _reference(car_feat, infra_feat, params, *, num_heads):
    """Pure-jnp f32 reference mirroring the PyTorch forward (eval mode)."""
    E = car_feat.shape[-1]
    Dh = E // num_heads
    lin = lambda x, w, b: x @ w + b
    q = lin(car_feat, params["wq"], params["bq"]).reshape(-1, num_heads, Dh)
    k = lin(infra_feat, params["wk"], params["bk"]).reshape(-1, num_heads, Dh)
    v = lin(infra_feat, params["wv"], params["bv"]).reshape(-1, num_heads, Dh)
    alpha = (q * k).sum(-1) / (Dh ** 0.5)
    alpha = jax.nn.softmax(alpha, axis=1)
    infra_att = (v * alpha[..., None]).reshape(-1, E)
    w = jax.nn.sigmoid(lin(car_feat, params["wih"], params["bih"]) +
                       lin(infra_att, params["whh"], params["bhh"]))
    return w * lin(car_feat, params["wself"], params["bself"]) + (1 - w) * infra_att


if __name__ == "__main__":
    N, E, H = 8, 32, 4  # nodes, embed_dim, num_heads
    key = jax.random.PRNGKey(0)
    keys = jax.random.split(key, 16)

    def mk_w(k):   # (E_in, E_out), already "transposed" Linear weight
        return jax.random.normal(k, (E, E), jnp.float32) * 0.1

    def mk_b(k):
        return jax.random.normal(k, (1, E), jnp.float32) * 0.1

    params = {
        "wq": mk_w(keys[0]),  "bq": mk_b(keys[1]),
        "wk": mk_w(keys[2]),  "bk": mk_b(keys[3]),
        "wv": mk_w(keys[4]),  "bv": mk_b(keys[5]),
        "wself": mk_w(keys[6]), "bself": mk_b(keys[7]),
        "wih": mk_w(keys[8]), "bih": mk_b(keys[9]),
        "whh": mk_w(keys[10]), "bhh": mk_b(keys[11]),
    }
    car_feat = jax.random.normal(keys[12], (N, E), jnp.float32)
    infra_feat = jax.random.normal(keys[13], (N, E), jnp.float32)

    ref = _reference(car_feat, infra_feat, params, num_heads=H)

    # Default fast path: bf16 matmuls with f32 accumulation.
    out_bf16 = cross_graph_attention(car_feat, infra_feat, params, num_heads=H)
    out_bf16 = jax.block_until_ready(out_bf16)
    assert out_bf16.shape == (N, E)
    assert jnp.allclose(out_bf16, ref, atol=3e-2, rtol=3e-2), "bf16 kernel mismatch vs jnp reference"

    # f32 compute path for a tight numeric check of the kernel structure.
    out_f32 = cross_graph_attention(car_feat, infra_feat, params, num_heads=H,
                                    compute_dtype=jnp.float32)
    out_f32 = jax.block_until_ready(out_f32)
    assert jnp.allclose(out_f32, ref, atol=2e-3, rtol=2e-3), "f32 kernel mismatch vs jnp reference"

    print("KERNEL_OK")
</pallas_src>

<mosaic_0001>
module attributes {stable_mosaic.version = 11 : i64} {
  func.func @_cross_graph_attention_kernel(%arg0: i32, %arg1: memref<16x128xbf16, #tpu.memory_space<vmem>>, %arg2: memref<16x128xbf16, #tpu.memory_space<vmem>>, %arg3: memref<128x384xbf16, #tpu.memory_space<vmem>>, %arg4: memref<1x384xf32, #tpu.memory_space<vmem>>, %arg5: memref<128x256xbf16, #tpu.memory_space<vmem>>, %arg6: memref<1x256xf32, #tpu.memory_space<vmem>>, %arg7: memref<128x128xbf16, #tpu.memory_space<vmem>>, %arg8: memref<1x128xf32, #tpu.memory_space<vmem>>, %arg9: memref<128x4xbf16, #tpu.memory_space<vmem>>, %arg10: memref<4x128xbf16, #tpu.memory_space<vmem>>, %arg11: memref<16x128xf32, #tpu.memory_space<vmem>>) attributes {dimension_semantics = [#tpu.dimension_semantics<parallel>], iteration_bounds = array<i64: 1>, scalar_prefetch = 0 : i64, scratch_operands = 0 : i64, tpu.core_type = #tpu.core_type<tc>, window_params = [{transform_indices = @transform_0, window_bounds = array<i64: 16, 128>}, {transform_indices = @transform_1, window_bounds = array<i64: 16, 128>}, {pipeline_mode = #tpu.pipeline_mode<synchronous>, transform_indices = @transform_2, window_bounds = array<i64: 128, 384>}, {pipeline_mode = #tpu.pipeline_mode<synchronous>, transform_indices = @transform_3, window_bounds = array<i64: 1, 384>}, {pipeline_mode = #tpu.pipeline_mode<synchronous>, transform_indices = @transform_4, window_bounds = array<i64: 128, 256>}, {pipeline_mode = #tpu.pipeline_mode<synchronous>, transform_indices = @transform_5, window_bounds = array<i64: 1, 256>}, {pipeline_mode = #tpu.pipeline_mode<synchronous>, transform_indices = @transform_6, window_bounds = array<i64: 128, 128>}, {pipeline_mode = #tpu.pipeline_mode<synchronous>, transform_indices = @transform_7, window_bounds = array<i64: 1, 128>}, {pipeline_mode = #tpu.pipeline_mode<synchronous>, transform_indices = @transform_8, window_bounds = array<i64: 128, 4>}, {pipeline_mode = #tpu.pipeline_mode<synchronous>, transform_indices = @transform_9, window_bounds = array<i64: 4, 128>}, {transform_indices = @transform_10, window_bounds = array<i64: 16, 128>}]} {
    %c0 = arith.constant 0 : index
    %c0_0 = arith.constant 0 : index
    %0 = vector.load %arg1[%c0, %c0_0] : memref<16x128xbf16, #tpu.memory_space<vmem>>, vector<16x128xbf16>
    %c0_1 = arith.constant 0 : index
    %c0_2 = arith.constant 0 : index
    %1 = vector.load %arg2[%c0_1, %c0_2] : memref<16x128xbf16, #tpu.memory_space<vmem>>, vector<16x128xbf16>
    %c0_3 = arith.constant 0 : index
    %c0_4 = arith.constant 0 : index
    %2 = vector.load %arg3[%c0_3, %c0_4] : memref<128x384xbf16, #tpu.memory_space<vmem>>, vector<128x384xbf16>
    %cst = arith.constant dense<0.000000e+00> : vector<16x384xf32>
    %3 = tpu.matmul %0, %2, %cst {dimension_numbers = #tpu.dot_dimension_numbers<[1], [0], [0], [1], [0, 0, 1, 1], [], []>} : vector<16x128xbf16>, vector<128x384xbf16>, vector<16x384xf32> -> vector<16x384xf32>
    %c0_5 = arith.constant 0 : index
    %c0_6 = arith.constant 0 : index
    %4 = vector.load %arg4[%c0_5, %c0_6] : memref<1x384xf32, #tpu.memory_space<vmem>>, vector<1x384xf32>
    %5 = vector.broadcast %4 : vector<1x384xf32> to vector<16x384xf32>
    %6 = arith.addf %3, %5 : vector<16x384xf32>
    %c0_7 = arith.constant 0 : index
    %c0_8 = arith.constant 0 : index
    %7 = vector.load %arg5[%c0_7, %c0_8] : memref<128x256xbf16, #tpu.memory_space<vmem>>, vector<128x256xbf16>
    %cst_9 = arith.constant dense<0.000000e+00> : vector<16x256xf32>
    %8 = tpu.matmul %1, %7, %cst_9 {dimension_numbers = #tpu.dot_dimension_numbers<[1], [0], [0], [1], [0, 0, 1, 1], [], []>} : vector<16x128xbf16>, vector<128x256xbf16>, vector<16x256xf32> -> vector<16x256xf32>
    %c0_10 = arith.constant 0 : index
    %c0_11 = arith.constant 0 : index
    %9 = vector.load %arg6[%c0_10, %c0_11] : memref<1x256xf32, #tpu.memory_space<vmem>>, vector<1x256xf32>
    %10 = vector.broadcast %9 : vector<1x256xf32> to vector<16x256xf32>
    %11 = arith.addf %8, %10 : vector<16x256xf32>
    %12 = vector.extract_strided_slice %6 {offsets = [0, 0], sizes = [16, 128], strides = [1, 1]} : vector<16x384xf32> to vector<16x128xf32>
    %13 = vector.extract_strided_slice %6 {offsets = [0, 128], sizes = [16, 128], strides = [1, 1]} : vector<16x384xf32> to vector<16x128xf32>
    %14 = vector.extract_strided_slice %6 {offsets = [0, 256], sizes = [16, 128], strides = [1, 1]} : vector<16x384xf32> to vector<16x128xf32>
    %15 = vector.extract_strided_slice %11 {offsets = [0, 0], sizes = [16, 128], strides = [1, 1]} : vector<16x256xf32> to vector<16x128xf32>
    %16 = vector.extract_strided_slice %11 {offsets = [0, 128], sizes = [16, 128], strides = [1, 1]} : vector<16x256xf32> to vector<16x128xf32>
    %17 = arith.mulf %12, %15 : vector<16x128xf32>
    %18 = arith.truncf %17 : vector<16x128xf32> to vector<16x128xbf16>
    %c0_12 = arith.constant 0 : index
    %c0_13 = arith.constant 0 : index
    %19 = vector.load %arg9[%c0_12, %c0_13] : memref<128x4xbf16, #tpu.memory_space<vmem>>, vector<128x4xbf16>
    %cst_14 = arith.constant dense<0.000000e+00> : vector<16x4xf32>
    %20 = tpu.matmul %18, %19, %cst_14 {dimension_numbers = #tpu.dot_dimension_numbers<[1], [0], [0], [1], [0, 0, 1, 1], [], []>} : vector<16x128xbf16>, vector<128x4xbf16>, vector<16x4xf32> -> vector<16x4xf32>
    %cst_15 = arith.constant 0.353553385 : f32
    %21 = vector.broadcast %cst_15 : f32 to vector<16x4xf32>
    %22 = arith.mulf %20, %21 : vector<16x4xf32>
    %cst_16 = arith.constant dense<0xFF800000> : vector<16xf32>
    %23 = vector.multi_reduction <maximumf>, %22, %cst_16 [1] : vector<16x4xf32> to vector<16xf32>
    %24 = vector.shape_cast %23 : vector<16xf32> to vector<16x1xf32>
    %25 = vector.broadcast %24 : vector<16x1xf32> to vector<16x4xf32>
    %26 = arith.subf %22, %25 : vector<16x4xf32>
    %27 = math.exp %26 : vector<16x4xf32>
    %cst_17 = arith.constant dense<0.000000e+00> : vector<16xf32>
    %28 = vector.multi_reduction <add>, %27, %cst_17 [1] : vector<16x4xf32> to vector<16xf32>
    %29 = vector.shape_cast %28 : vector<16xf32> to vector<16x1xf32>
    %30 = tpu.reciprocal %29 {approx = true} : vector<16x1xf32> -> vector<16x1xf32>
    %31 = arith.mulf %29, %30 : vector<16x1xf32>
    %cst_18 = arith.constant 2.000000e+00 : f32
    %32 = vector.broadcast %cst_18 : f32 to vector<16x1xf32>
    %33 = arith.subf %32, %31 : vector<16x1xf32>
    %34 = arith.mulf %30, %33 : vector<16x1xf32>
    %35 = vector.broadcast %34 : vector<16x1xf32> to vector<16x4xf32>
    %36 = arith.mulf %27, %35 : vector<16x4xf32>
    %37 = arith.truncf %36 : vector<16x4xf32> to vector<16x4xbf16>
    %c0_19 = arith.constant 0 : index
    %c0_20 = arith.constant 0 : index
    %38 = vector.load %arg10[%c0_19, %c0_20] : memref<4x128xbf16, #tpu.memory_space<vmem>>, vector<4x128xbf16>
    %cst_21 = arith.constant dense<0.000000e+00> : vector<16x128xf32>
    %39 = tpu.matmul %37, %38, %cst_21 {dimension_numbers = #tpu.dot_dimension_numbers<[1], [0], [0], [1], [0, 0, 1, 1], [], []>} : vector<16x4xbf16>, vector<4x128xbf16>, vector<16x128xf32> -> vector<16x128xf32>
    %40 = arith.mulf %16, %39 : vector<16x128xf32>
    %41 = arith.truncf %40 : vector<16x128xf32> to vector<16x128xbf16>
    %c0_22 = arith.constant 0 : index
    %c0_23 = arith.constant 0 : index
    %42 = vector.load %arg7[%c0_22, %c0_23] : memref<128x128xbf16, #tpu.memory_space<vmem>>, vector<128x128xbf16>
    %cst_24 = arith.constant dense<0.000000e+00> : vector<16x128xf32>
    %43 = tpu.matmul %41, %42, %cst_24 {dimension_numbers = #tpu.dot_dimension_numbers<[1], [0], [0], [1], [0, 0, 1, 1], [], []>} : vector<16x128xbf16>, vector<128x128xbf16>, vector<16x128xf32> -> vector<16x128xf32>
    %44 = arith.addf %13, %43 : vector<16x128xf32>
    %c0_25 = arith.constant 0 : index
    %c0_26 = arith.constant 0 : index
    %45 = vector.load %arg8[%c0_25, %c0_26] : memref<1x128xf32, #tpu.memory_space<vmem>>, vector<1x128xf32>
    %46 = vector.broadcast %45 : vector<1x128xf32> to vector<16x128xf32>
    %47 = arith.addf %44, %46 : vector<16x128xf32>
    %48 = arith.negf %47 : vector<16x128xf32>
    %49 = math.exp %48 : vector<16x128xf32>
    %cst_27 = arith.constant 1.000000e+00 : f32
    %50 = vector.broadcast %cst_27 : f32 to vector<16x128xf32>
    %51 = arith.addf %50, %49 : vector<16x128xf32>
    %52 = arith.divf %50, %51 : vector<16x128xf32>
    %53 = arith.subf %14, %40 : vector<16x128xf32>
    %54 = arith.mulf %52, %53 : vector<16x128xf32>
    %55 = arith.addf %40, %54 : vector<16x128xf32>
    %c0_28 = arith.constant 0 : index
    %c0_29 = arith.constant 0 : index
    %56 = vector.load %arg11[%c0_28, %c0_29] : memref<16x128xf32, #tpu.memory_space<vmem>>, vector<16x128xf32>
    tpu.vector_store %arg11[%c0_28, %c0_29], %55 {strides = array<i32>} : memref<16x128xf32, #tpu.memory_space<vmem>>, vector<16x128xf32>,
    return
  }
  func.func @transform_0(%arg0: i32) -> (i32, i32) {
    %c0_i32 = arith.constant 0 : i32
    %c0_i32_0 = arith.constant 0 : i32
    return %arg0, %c0_i32 : i32, i32
  }
  func.func @transform_1(%arg0: i32) -> (i32, i32) {
    %c0_i32 = arith.constant 0 : i32
    %c0_i32_0 = arith.constant 0 : i32
    return %arg0, %c0_i32 : i32, i32
  }
  func.func @transform_2(%arg0: i32) -> (i32, i32) {
    %c0_i32 = arith.constant 0 : i32
    %c0_i32_0 = arith.constant 0 : i32
    %c0_i32_1 = arith.constant 0 : i32
    return %c0_i32, %c0_i32_0 : i32, i32
  }
  func.func @transform_3(%arg0: i32) -> (i32, i32) {
    %c0_i32 = arith.constant 0 : i32
    %c0_i32_0 = arith.constant 0 : i32
    %c0_i32_1 = arith.constant 0 : i32
    return %c0_i32, %c0_i32_0 : i32, i32
  }
  func.func @transform_4(%arg0: i32) -> (i32, i32) {
    %c0_i32 = arith.constant 0 : i32
    %c0_i32_0 = arith.constant 0 : i32
    %c0_i32_1 = arith.constant 0 : i32
    return %c0_i32, %c0_i32_0 : i32, i32
  }
  func.func @transform_5(%arg0: i32) -> (i32, i32) {
    %c0_i32 = arith.constant 0 : i32
    %c0_i32_0 = arith.constant 0 : i32
    %c0_i32_1 = arith.constant 0 : i32
    return %c0_i32, %c0_i32_0 : i32, i32
  }
  func.func @transform_6(%arg0: i32) -> (i32, i32) {
    %c0_i32 = arith.constant 0 : i32
    %c0_i32_0 = arith.constant 0 : i32
    %c0_i32_1 = arith.constant 0 : i32
    return %c0_i32, %c0_i32_0 : i32, i32
  }
  func.func @transform_7(%arg0: i32) -> (i32, i32) {
    %c0_i32 = arith.constant 0 : i32
    %c0_i32_0 = arith.constant 0 : i32
    %c0_i32_1 = arith.constant 0 : i32
    return %c0_i32, %c0_i32_0 : i32, i32
  }
  func.func @transform_8(%arg0: i32) -> (i32, i32) {
    %c0_i32 = arith.constant 0 : i32
    %c0_i32_0 = arith.constant 0 : i32
    %c0_i32_1 = arith.constant 0 : i32
    return %c0_i32, %c0_i32_0 : i32, i32
  }
  func.func @transform_9(%arg0: i32) -> (i32, i32) {
    %c0_i32 = arith.constant 0 : i32
    %c0_i32_0 = arith.constant 0 : i32
    %c0_i32_1 = arith.constant 0 : i32
    return %c0_i32, %c0_i32_0 : i32, i32
  }
  func.func @transform_10(%arg0: i32) -> (i32, i32) {
    %c0_i32 = arith.constant 0 : i32
    %c0_i32_0 = arith.constant 0 : i32
    return %arg0, %c0_i32 : i32, i32
  }
}

module attributes {stable_mosaic.version = 11 : i64} {
  func.func @_cross_graph_attention_kernel(%arg0: i32, %arg1: memref<16x128xbf16, #tpu.memory_space<vmem>>, %arg2: memref<16x128xbf16, #tpu.memory_space<vmem>>, %arg3: memref<128x384xbf16, #tpu.memory_space<vmem>>, %arg4: memref<1x384xf32, #tpu.memory_space<vmem>>, %arg5: memref<128x256xbf16, #tpu.memory_space<vmem>>, %arg6: memref<1x256xf32, #tpu.memory_space<vmem>>, %arg7: memref<128x128xbf16, #tpu.memory_space<vmem>>, %arg8: memref<1x128xf32, #tpu.memory_space<vmem>>, %arg9: memref<128x4xbf16, #tpu.memory_space<vmem>>, %arg10: memref<4x128xbf16, #tpu.memory_space<vmem>>, %arg11: memref<16x128xf32, #tpu.memory_space<vmem>>) attributes {dimension_semantics = [#tpu.dimension_semantics<parallel>], iteration_bounds = array<i64: 1>, scalar_prefetch = 0 : i64, scratch_operands = 0 : i64, tpu.core_type = #tpu.core_type<tc>, window_params = [{transform_indices = @transform_0, window_bounds = array<i64: 16, 128>}, {transform_indices = @transform_1, window_bounds = array<i64: 16, 128>}, {pipeline_mode = #tpu.pipeline_mode<synchronous>, transform_indices = @transform_2, window_bounds = array<i64: 128, 384>}, {pipeline_mode = #tpu.pipeline_mode<synchronous>, transform_indices = @transform_3, window_bounds = array<i64: 1, 384>}, {pipeline_mode = #tpu.pipeline_mode<synchronous>, transform_indices = @transform_4, window_bounds = array<i64: 128, 256>}, {pipeline_mode = #tpu.pipeline_mode<synchronous>, transform_indices = @transform_5, window_bounds = array<i64: 1, 256>}, {pipeline_mode = #tpu.pipeline_mode<synchronous>, transform_indices = @transform_6, window_bounds = array<i64: 128, 128>}, {pipeline_mode = #tpu.pipeline_mode<synchronous>, transform_indices = @transform_7, window_bounds = array<i64: 1, 128>}, {pipeline_mode = #tpu.pipeline_mode<synchronous>, transform_indices = @transform_8, window_bounds = array<i64: 128, 4>}, {pipeline_mode = #tpu.pipeline_mode<synchronous>, transform_indices = @transform_9, window_bounds = array<i64: 4, 128>}, {transform_indices = @transform_10, window_bounds = array<i64: 16, 128>}]} {
    %c0 = arith.constant 0 : index
    %c0_0 = arith.constant 0 : index
    %0 = vector.load %arg1[%c0, %c0_0] : memref<16x128xbf16, #tpu.memory_space<vmem>>, vector<16x128xbf16>
    %c0_1 = arith.constant 0 : index
    %c0_2 = arith.constant 0 : index
    %1 = vector.load %arg2[%c0_1, %c0_2] : memref<16x128xbf16, #tpu.memory_space<vmem>>, vector<16x128xbf16>
    %c0_3 = arith.constant 0 : index
    %c0_4 = arith.constant 0 : index
    %2 = vector.load %arg3[%c0_3, %c0_4] : memref<128x384xbf16, #tpu.memory_space<vmem>>, vector<128x384xbf16>
    %cst = arith.constant dense<0.000000e+00> : vector<16x384xf32>
    %3 = tpu.matmul %0, %2, %cst {dimension_numbers = #tpu.dot_dimension_numbers<[1], [0], [0], [1], [0, 0, 1, 1], [], []>} : vector<16x128xbf16>, vector<128x384xbf16>, vector<16x384xf32> -> vector<16x384xf32>
    %c0_5 = arith.constant 0 : index
    %c0_6 = arith.constant 0 : index
    %4 = vector.load %arg4[%c0_5, %c0_6] : memref<1x384xf32, #tpu.memory_space<vmem>>, vector<1x384xf32>
    %5 = vector.broadcast %4 : vector<1x384xf32> to vector<16x384xf32>
    %6 = arith.addf %3, %5 : vector<16x384xf32>
    %c0_7 = arith.constant 0 : index
    %c0_8 = arith.constant 0 : index
    %7 = vector.load %arg5[%c0_7, %c0_8] : memref<128x256xbf16, #tpu.memory_space<vmem>>, vector<128x256xbf16>
    %cst_9 = arith.constant dense<0.000000e+00> : vector<16x256xf32>
    %8 = tpu.matmul %1, %7, %cst_9 {dimension_numbers = #tpu.dot_dimension_numbers<[1], [0], [0], [1], [0, 0, 1, 1], [], []>} : vector<16x128xbf16>, vector<128x256xbf16>, vector<16x256xf32> -> vector<16x256xf32>
    %c0_10 = arith.constant 0 : index
    %c0_11 = arith.constant 0 : index
    %9 = vector.load %arg6[%c0_10, %c0_11] : memref<1x256xf32, #tpu.memory_space<vmem>>, vector<1x256xf32>
    %10 = vector.broadcast %9 : vector<1x256xf32> to vector<16x256xf32>
    %11 = arith.addf %8, %10 : vector<16x256xf32>
    %12 = vector.extract_strided_slice %6 {offsets = [0, 0], sizes = [16, 128], strides = [1, 1]} : vector<16x384xf32> to vector<16x128xf32>
    %13 = vector.extract_strided_slice %6 {offsets = [0, 128], sizes = [16, 128], strides = [1, 1]} : vector<16x384xf32> to vector<16x128xf32>
    %14 = vector.extract_strided_slice %6 {offsets = [0, 256], sizes = [16, 128], strides = [1, 1]} : vector<16x384xf32> to vector<16x128xf32>
    %15 = vector.extract_strided_slice %11 {offsets = [0, 0], sizes = [16, 128], strides = [1, 1]} : vector<16x256xf32> to vector<16x128xf32>
    %16 = vector.extract_strided_slice %11 {offsets = [0, 128], sizes = [16, 128], strides = [1, 1]} : vector<16x256xf32> to vector<16x128xf32>
    %17 = arith.mulf %12, %15 : vector<16x128xf32>
    %18 = arith.truncf %17 : vector<16x128xf32> to vector<16x128xbf16>
    %c0_12 = arith.constant 0 : index
    %c0_13 = arith.constant 0 : index
    %19 = vector.load %arg9[%c0_12, %c0_13] : memref<128x4xbf16, #tpu.memory_space<vmem>>, vector<128x4xbf16>
    %cst_14 = arith.constant dense<0.000000e+00> : vector<16x4xf32>
    %20 = tpu.matmul %18, %19, %cst_14 {dimension_numbers = #tpu.dot_dimension_numbers<[1], [0], [0], [1], [0, 0, 1, 1], [], []>} : vector<16x128xbf16>, vector<128x4xbf16>, vector<16x4xf32> -> vector<16x4xf32>
    %cst_15 = arith.constant 0.353553385 : f32
    %21 = vector.broadcast %cst_15 : f32 to vector<16x4xf32>
    %22 = arith.mulf %20, %21 : vector<16x4xf32>
    %cst_16 = arith.constant dense<0xFF800000> : vector<16xf32>
    %23 = vector.multi_reduction <maximumf>, %22, %cst_16 [1] : vector<16x4xf32> to vector<16xf32>
    %24 = vector.shape_cast %23 : vector<16xf32> to vector<16x1xf32>
    %25 = vector.broadcast %24 : vector<16x1xf32> to vector<16x4xf32>
    %26 = arith.subf %22, %25 : vector<16x4xf32>
    %27 = math.exp %26 : vector<16x4xf32>
    %cst_17 = arith.constant dense<0.000000e+00> : vector<16xf32>
    %28 = vector.multi_reduction <add>, %27, %cst_17 [1] : vector<16x4xf32> to vector<16xf32>
    %29 = vector.shape_cast %28 : vector<16xf32> to vector<16x1xf32>
    %30 = tpu.reciprocal %29 {approx = true} : vector<16x1xf32> -> vector<16x1xf32>
    %31 = arith.mulf %29, %30 : vector<16x1xf32>
    %cst_18 = arith.constant 2.000000e+00 : f32
    %32 = vector.broadcast %cst_18 : f32 to vector<16x1xf32>
    %33 = arith.subf %32, %31 : vector<16x1xf32>
    %34 = arith.mulf %30, %33 : vector<16x1xf32>
    %35 = vector.broadcast %34 : vector<16x1xf32> to vector<16x4xf32>
    %36 = arith.mulf %27, %35 : vector<16x4xf32>
    %37 = arith.truncf %36 : vector<16x4xf32> to vector<16x4xbf16>
    %c0_19 = arith.constant 0 : index
    %c0_20 = arith.constant 0 : index
    %38 = vector.load %arg10[%c0_19, %c0_20] : memref<4x128xbf16, #tpu.memory_space<vmem>>, vector<4x128xbf16>
    %cst_21 = arith.constant dense<0.000000e+00> : vector<16x128xf32>
    %39 = tpu.matmul %37, %38, %cst_21 {dimension_numbers = #tpu.dot_dimension_numbers<[1], [0], [0], [1], [0, 0, 1, 1], [], []>} : vector<16x4xbf16>, vector<4x128xbf16>, vector<16x128xf32> -> vector<16x128xf32>
    %40 = arith.mulf %16, %39 : vector<16x128xf32>
    %41 = arith.truncf %40 : vector<16x128xf32> to vector<16x128xbf16>
    %c0_22 = arith.constant 0 : index
    %c0_23 = arith.constant 0 : index
    %42 = vector.load %arg7[%c0_22, %c0_23] : memref<128x128xbf16, #tpu.memory_space<vmem>>, vector<128x128xbf16>
    %cst_24 = arith.constant dense<0.000000e+00> : vector<16x128xf32>
    %43 = tpu.matmul %41, %42, %cst_24 {dimension_numbers = #tpu.dot_dimension_numbers<[1], [0], [0], [1], [0, 0, 1, 1], [], []>} : vector<16x128xbf16>, vector<128x128xbf16>, vector<16x128xf32> -> vector<16x128xf32>
    %44 = arith.addf %13, %43 : vector<16x128xf32>
    %c0_25 = arith.constant 0 : index
    %c0_26 = arith.constant 0 : index
    %45 = vector.load %arg8[%c0_25, %c0_26] : memref<1x128xf32, #tpu.memory_space<vmem>>, vector<1x128xf32>
    %46 = vector.broadcast %45 : vector<1x128xf32> to vector<16x128xf32>
    %47 = arith.addf %44, %46 : vector<16x128xf32>
    %48 = arith.negf %47 : vector<16x128xf32>
    %49 = math.exp %48 : vector<16x128xf32>
    %cst_27 = arith.constant 1.000000e+00 : f32
    %50 = vector.broadcast %cst_27 : f32 to vector<16x128xf32>
    %51 = arith.addf %50, %49 : vector<16x128xf32>
    %52 = arith.divf %50, %51 : vector<16x128xf32>
    %53 = arith.subf %14, %40 : vector<16x128xf32>
    %54 = arith.mulf %52, %53 : vector<16x128xf32>
    %55 = arith.addf %40, %54 : vector<16x128xf32>
    %c0_28 = arith.constant 0 : index
    %c0_29 = arith.constant 0 : index
    %56 = vector.load %arg11[%c0_28, %c0_29] : memref<16x128xf32, #tpu.memory_space<vmem>>, vector<16x128xf32>
    tpu.vector_store %arg11[%c0_28, %c0_29], %55 {strides = array<i32>} : memref<16x128xf32, #tpu.memory_space<vmem>>, vector<16x128xf32>,
    return
  }
  func.func @transform_0(%arg0: i32) -> (i32, i32) {
    %c0_i32 = arith.constant 0 : i32
    %c0_i32_0 = arith.constant 0 : i32
    return %arg0, %c0_i32 : i32, i32
  }
  func.func @transform_1(%arg0: i32) -> (i32, i32) {
    %c0_i32 = arith.constant 0 : i32
    %c0_i32_0 = arith.constant 0 : i32
    return %arg0, %c0_i32 : i32, i32
  }
  func.func @transform_2(%arg0: i32) -> (i32, i32) {
    %c0_i32 = arith.constant 0 : i32
    %c0_i32_0 = arith.constant 0 : i32
    %c0_i32_1 = arith.constant 0 : i32
    return %c0_i32, %c0_i32_0 : i32, i32
  }
  func.func @transform_3(%arg0: i32) -> (i32, i32) {
    %c0_i32 = arith.constant 0 : i32
    %c0_i32_0 = arith.constant 0 : i32
    %c0_i32_1 = arith.constant 0 : i32
    return %c0_i32, %c0_i32_0 : i32, i32
  }
  func.func @transform_4(%arg0: i32) -> (i32, i32) {
    %c0_i32 = arith.constant 0 : i32
    %c0_i32_0 = arith.constant 0 : i32
    %c0_i32_1 = arith.constant 0 : i32
    return %c0_i32, %c0_i32_0 : i32, i32
  }
  func.func @transform_5(%arg0: i32) -> (i32, i32) {
    %c0_i32 = arith.constant 0 : i32
    %c0_i32_0 = arith.constant 0 : i32
    %c0_i32_1 = arith.constant 0 : i32
    return %c0_i32, %c0_i32_0 : i32, i32
  }
  func.func @transform_6(%arg0: i32) -> (i32, i32) {
    %c0_i32 = arith.constant 0 : i32
    %c0_i32_0 = arith.constant 0 : i32
    %c0_i32_1 = arith.constant 0 : i32
    return %c0_i32, %c0_i32_0 : i32, i32
  }
  func.func @transform_7(%arg0: i32) -> (i32, i32) {
    %c0_i32 = arith.constant 0 : i32
    %c0_i32_0 = arith.constant 0 : i32
    %c0_i32_1 = arith.constant 0 : i32
    return %c0_i32, %c0_i32_0 : i32, i32
  }
  func.func @transform_8(%arg0: i32) -> (i32, i32) {
    %c0_i32 = arith.constant 0 : i32
    %c0_i32_0 = arith.constant 0 : i32
    %c0_i32_1 = arith.constant 0 : i32
    return %c0_i32, %c0_i32_0 : i32, i32
  }
  func.func @transform_9(%arg0: i32) -> (i32, i32) {
    %c0_i32 = arith.constant 0 : i32
    %c0_i32_0 = arith.constant 0 : i32
    %c0_i32_1 = arith.constant 0 : i32
    return %c0_i32, %c0_i32_0 : i32, i32
  }
  func.func @transform_10(%arg0: i32) -> (i32, i32) {
    %c0_i32 = arith.constant 0 : i32
    %c0_i32_0 = arith.constant 0 : i32
    return %arg0, %c0_i32 : i32, i32
  }
}

</mosaic_0001>

<bundles_post_ra>
// kernel: tpu_custom_call.1
= control target key start
LH: loop header
LB: loop body
LE: loop exit
PB: predicated region body
PF: predicated region fallthrough
CT: control target
= control target key end

     0   :  { %15 = vsyncpa [#allocation3], 0  ;;  %s1416_s0 = inlined_call_operand.hbm [shape: bf16[16,128], index: 0, kind: input, shape index: {}]   ;;  %s1417_s1 = inlined_call_operand.hbm [shape: bf16[16,128], index: 1, kind: input, shape index: {}]   ;;  %s1418_s2 = inlined_call_operand.hbm [shape: bf16[128,384], index: 2, kind: input, shape index: {}]   ;;  %s1419_s3 = inlined_call_operand.vmem [shape: f32[1,384], index: 3, kind: input, shape index: {}]   ;;  %s1420_s4 = inlined_call_operand.hbm [shape: bf16[128,256], index: 4, kind: input, shape index: {}]   ;;  %s1421_s5 = inlined_call_operand.hbm [shape: f32[1,256], index: 5, kind: input, shape index: {}]   ;;  %s1422_s6 = inlined_call_operand.vmem [shape: bf16[128,128], index: 6, kind: input, shape index: {}]   ;;  %s1423_s7 = inlined_call_operand.vmem [shape: f32[1,128], index: 7, kind: input, shape index: {}]   ;;  %s1424_s8 = inlined_call_operand.vmem [shape: bf16[128,4], index: 8, kind: input, shape index: {}]   ;;  %s1425_s9 = inlined_call_operand.vmem [shape: bf16[4,128], index: 9, kind: input, shape index: {}]   ;;  %s1426_s10 = inlined_call_operand.hbm [shape: f32[16,128], index: 10, kind: output, shape index: {}]  }
   0x1   :  { %16 = vsyncpa [#allocation6], 0 }
   0x2   :  { %17 = vsyncpa [#allocation9], 0 }
   0x3   :  { %18 = vsyncpa [#allocation4], 0  ;;  %s36_s15 = sshll.u32 %s1417_s1, 4  ;;  %s1234_s16 = smov [#allocation5]   ;;  %s37_s15 = int_to_ptr.hbm [resolvable:$true] %s36_s15 }
   0x4   :  { %s38_s17 = sshll.u32 %s1234_s16, 4  ;;  %s64_s20 = sshll.u32 %s1420_s4, 4  ;;  %s39_s17 = int_to_ptr.vmem [resolvable:$true] %s38_s17  ;;  %s65_s20 = int_to_ptr.hbm [resolvable:$true] %s64_s20 }
   0x5   :  { %s1235_s21 = smov 64   ;;  %s1236_s22 = smov 4  }
   0x6   :  { %44 = dma.hbm_to_vmem [thread:$0]  %s37_s15, 128, %s39_s17, [#allocation6], %s1235_s21, %s1235_s21, %s1236_s22  }
   0x7   :  { %s1237_s23 = smov [#allocation8]   ;;  %s1238_s25 = smov 128  }
   0x8   :  { %s66_s24 = sshll.u32 %s1237_s23, 4  ;;  %s1239_s26 = smov 8   ;;  %s67_s24 = int_to_ptr.vmem [resolvable:$true] %s66_s24 }
   0x9   :  { %72 = dma.hbm_to_vmem [thread:$0]  %s65_s20, 2048, %s67_s24, [#allocation9], %s1238_s25, %s1238_s25, %s1239_s26  }
   0xa   :  { %s23_s28 = sshll.u32 %s1416_s0, 4  ;;  %s1240_s29 = smov [#allocation2]   ;;  %s24_s28 = int_to_ptr.hbm [resolvable:$true] %s23_s28 }
   0xb   :  { %s25_s4 = sshll.u32 %s1240_s29, 4  ;;  %s49_s12 = sshll.u32 %s1418_s2, 4  ;;  %s26_s4 = int_to_ptr.vmem [resolvable:$true] %s25_s4  ;;  %s50_s12 = int_to_ptr.hbm [resolvable:$true] %s49_s12 }
   0xc   :  { %31 = dma.hbm_to_vmem [thread:$0]  %s24_s28, 128, %s26_s4, [#allocation3], %s1235_s21, %s1235_s21, %s1236_s22  }
   0xd   :  { %s1241_s13 = smov [#allocation7]   ;;  %s1242_s15 = smov 192  }
   0xe   :  { %s51_s14 = sshll.u32 %s1241_s13, 4  ;;  %s1243_s16 = smov 12   ;;  %s52_s14 = int_to_ptr.vmem [resolvable:$true] %s51_s14 }
   0xf   :  { %57 = dma.hbm_to_vmem [thread:$0]  %s50_s12, 3072, %s52_s14, [#allocation6], %s1242_s15, %s1242_s15, %s1243_s16  }
  0x10   :  { %s78_s0 = sshll.u32 %s1421_s5, 4  ;;  %s1244_s19 = smov [#allocation10]   ;;  %s79_s0 = int_to_ptr.hbm [resolvable:$true] %s78_s0 }
  0x11   :  { %s80_s20 = sshll.u32 %s1244_s19, 4  ;;  %s81_s20 = int_to_ptr.vmem [resolvable:$true] %s80_s20 }
  0x12   :  { %83 = dma.hbm_to_vmem [thread:$0]  %s79_s0, 32, %s81_s20, [#allocation9]  }
  0x13   :  { %1226 = dma.done.wait [#allocation3], 128  }
  0x14   :  { %1227 = vsyncadd [#allocation3], 4294967168 }
  0x15   :  { %1228 = dma.done.wait [#allocation6], 3200  }
  0x16   :  { %1229 = vsyncadd [#allocation6], 4294964096 }
  0x17   :  { %1230 = dma.done.wait [#allocation9], 2080  }
  0x18   :  { %1231 = vsyncadd [#allocation9], 4294965216  ;;  %v850_v0 = vld [vmem:[#allocation7 + $0xa8] sm:$0xf]  ;;  %v1019_v1 = vld [vmem:[#allocation7 + $0xb0] sm:$0xf0] }
  0x19   :  { %v922_v2 = vld [vmem:[#allocation8 + $0x70] sm:$0xf]  ;;  %v851_v3 = vor.u32 %v1019_v1, %v850_v0  ;;  %v1036_v4 = vld [vmem:[#allocation8 + $0x74] sm:$0xf0]  ;;  %v1016_v6 = vld [vmem:[#allocation7 + $0x98] sm:$0xf0] }
  0x1a   :  { %v838_v5 = vld [vmem:[#allocation7 + $0x90] sm:$0xf]  ;;  %v923_v7 = vor.u32 %v1036_v4, %v922_v2  ;;  %v914_v8 = vld [vmem:[#allocation8 + $0x60] sm:$0xf]  ;;  %v1034_v9 = vld [vmem:[#allocation8 + $0x64] sm:$0xf0] }
  0x1b   :  { %291 = vmatpush.bf16.msra.mxu0 %v851_v3  ;;  %v839_v10 = vor.u32 %v1016_v6, %v838_v5  ;;  %v915_v11 = vor.u32 %v1034_v9, %v914_v8  ;;  %v826_v12 = vld [vmem:[#allocation7 + $0x78] sm:$0xf]  ;;  %v1013_v13 = vld [vmem:[#allocation7 + $0x80] sm:$0xf0]  ;;  %v906_v14 = vld [vmem:[#allocation8 + $0x50] sm:$0xf] }
  0x1c   :  { %441 = vmatpush.bf16.msra.mxu3 %v923_v7  ;;  %v1032_v15 = vld [vmem:[#allocation8 + $0x54] sm:$0xf0]  ;;  %v827_v16 = vor.u32 %v1013_v13, %v826_v12  ;;  %v814_v18 = vld [vmem:[#allocation7 + $0x60] sm:$0xf]  ;;  %v1010_v19 = vld [vmem:[#allocation7 + $0x68] sm:$0xf0] }
  0x1d   :  { %v907_v17 = vor.u32 %v1032_v15, %v906_v14  ;;  %v898_v20 = vld [vmem:[#allocation8 + $0x40] sm:$0xf]  ;;  %v1030_v21 = vld [vmem:[#allocation8 + $0x44] sm:$0xf0]  ;;  %v815_v22 = vor.u32 %v1010_v19, %v814_v18  ;;  %v1018_v24 = vld [vmem:[#allocation7 + $0xac] sm:$0xf] }
  0x1e   :  { %v802_v23 = vld [vmem:[#allocation7 + $0x48] sm:$0xf]  ;;  %v852_v25 = vld [vmem:[#allocation7 + $0xb4] sm:$0xf0]  ;;  %v899_v26 = vor.u32 %v1030_v21, %v898_v20  ;;  %v1007_v27 = vld [vmem:[#allocation7 + $0x50] sm:$0xf0] }
  0x1f   :  { %292 = vmatpush.bf16.msra.mxu0 %v839_v10  ;;  %v855_v28 = vor.u32 %v1018_v24, %v852_v25  ;;  %v1015_v29 = vld [vmem:[#allocation7 + $0x94] sm:$0xf]  ;;  %v840_v30 = vld [vmem:[#allocation7 + $0x9c] sm:$0xf0]  ;;  %v890_v31 = vld [vmem:[#allocation8 + $0x30] sm:$0xf]  ;;  %v803_v34 = vor.u32 %v1007_v27, %v802_v23 }
  0x20   :  { %442 = vmatpush.bf16.msra.mxu3 %v915_v11  ;;  %v1028_v32 = vld [vmem:[#allocation8 + $0x34] sm:$0xf0]  ;;  %v843_v33 = vor.u32 %v1015_v29, %v840_v30  ;;  %v1012_v35 = vld [vmem:[#allocation7 + $0x7c] sm:$0xf]  ;;  %v828_v36 = vld [vmem:[#allocation7 + $0x84] sm:$0xf0] }
  0x21   :  { %305 = vmatpush.bf16.msra.mxu1 %v855_v28  ;;  %v891_v37 = vor.u32 %v1028_v32, %v890_v31  ;;  %v790_v38 = vld [vmem:[#allocation7 + $0x30] sm:$0xf]  ;;  %v1004_v39 = vld [vmem:[#allocation7 + $0x38] sm:$0xf0]  ;;  %v882_v40 = vld [vmem:[#allocation8 + $0x20] sm:$0xf]  ;;  %v831_v42 = vor.u32 %v1012_v35, %v828_v36 }
  0x22   :  { %v1026_v41 = vld [vmem:[#allocation8 + $0x24] sm:$0xf0]  ;;  %v791_v43 = vor.u32 %v1004_v39, %v790_v38  ;;  %v1009_v44 = vld [vmem:[#allocation7 + $0x64] sm:$0xf]  ;;  %v816_v45 = vld [vmem:[#allocation7 + $0x6c] sm:$0xf0] }
  0x23   :  { %293 = vmatpush.bf16.msra.mxu0 %v827_v16  ;;  %v883_v46 = vor.u32 %v1026_v41, %v882_v40  ;;  %v778_v47 = vld [vmem:[#allocation7 + $0x18] sm:$0xf]  ;;  %v1001_v48 = vld [vmem:[#allocation7 + $0x20] sm:$0xf0]  ;;  %v874_v49 = vld [vmem:[#allocation8 + $0x10] sm:$0xf]  ;;  %v819_v51 = vor.u32 %v1009_v44, %v816_v45 }
  0x24   :  { %443 = vmatpush.bf16.msra.mxu3 %v907_v17  ;;  %v1024_v50 = vld [vmem:[#allocation8 + $0x14] sm:$0xf0]  ;;  %v779_v52 = vor.u32 %v1001_v48, %v778_v47  ;;  %v1006_v53 = vld [vmem:[#allocation7 + $0x4c] sm:$0xf]  ;;  %v766_v56 = vld [vmem:[#allocation7] sm:$0xf] }
  0x25   :  { %306 = vmatpush.bf16.msra.mxu1 %v843_v33  ;;  %v804_v54 = vld [vmem:[#allocation7 + $0x54] sm:$0xf0]  ;;  %v875_v55 = vor.u32 %v1024_v50, %v874_v49  ;;  %v998_v57 = vld [vmem:[#allocation7 + $0x8] sm:$0xf0]  ;;  %v866_v58 = vld [vmem:[#allocation8] sm:$0xf] }
  0x26   :  { %v1022_v59 = vld [vmem:[#allocation8 + $0x4] sm:$0xf0]  ;;  %v807_v60 = vor.u32 %v1006_v53, %v804_v54  ;;  %v767_v61 = vor.u32 %v998_v57, %v766_v56  ;;  %v1003_v62 = vld [vmem:[#allocation7 + $0x34] sm:$0xf]  ;;  %v792_v63 = vld [vmem:[#allocation7 + $0x3c] sm:$0xf0] }
  0x27   :  { %294 = vmatpush.bf16.msra.mxu0 %v815_v22  ;;  %v867_v0 = vor.u32 %v1022_v59, %v866_v58  ;;  %v1319_v1 = vld [vmem:[#allocation2] sm:$0xff]  ;;  %v795_v2 = vor.u32 %v1003_v62, %v792_v63  ;;  %v1321_v3 = vld [vmem:[#allocation5] sm:$0xff]  ;;  %v780_v5 = vld [vmem:[#allocation7 + $0x24] sm:$0xf0]  ;;  %vm552_vm0 = vcmask 31744   ;;  %vm586_vm1 = vcmask 1041408  }
  0x28   :  { %444 = vmatpush.bf16.msra.mxu3 %v899_v26  ;;  %v1000_v4 = vld [vmem:[#allocation7 + $0x1c] sm:$0xf]  ;;  %v997_v7 = vld [vmem:[#allocation7 + $0x4] sm:$0xf]  ;;  %v768_v8 = vld [vmem:[#allocation7 + $0xc] sm:$0xf0] }
  0x29   :  { %307 = vmatpush.bf16.msra.mxu1 %v831_v42  ;;  %v783_v6 = vor.u32 %v1000_v4, %v780_v5  ;;  %v771_v9 = vor.u32 %v997_v7, %v768_v8  ;;  %v1044_v10 = vld [vmem:[%s1424_s8 + $0x38] sm:$0xff]  ;;  %v1043_v11 = vld [vmem:[%s1424_s8 + $0x30] sm:$0xff]  ;;  %v1042_v12 = vld [vmem:[%s1424_s8 + $0x28] sm:$0xff]  ;;  %s745_s13 = sshll.u32 %s1426_s10, 4  ;;  %s746_s13 = int_to_ptr.hbm [resolvable:$true] %s745_s13 }
  0x2a   :  { %v1041_v13 = vld [vmem:[%s1424_s8 + $0x20] sm:$0xff]  ;;  %v1040_v14 = vld [vmem:[%s1424_s8 + $0x18] sm:$0xff]  ;;  %v1039_v15 = vld [vmem:[%s1424_s8 + $0x10] sm:$0xff] }
  0x2b   :  { %295 = vmatpush.bf16.msra.mxu0 %v803_v34  ;;  %v1038_v16 = vld [vmem:[%s1424_s8 + $0x8] sm:$0xff]  ;;  %v1037_v17 = vld [vmem:[%s1424_s8] sm:$0xff]  ;;  %v1355_v20 = vld [vmem:[#allocation10] sm:$0x3] }
  0x2c   :  { %445 = vmatpush.bf16.msra.mxu3 %v891_v37  ;;  %v1353_v19 = vld [vmem:[%s1419_s3] sm:$0x7]  ;;  %v351_v23 = vperm.slane %v1355_v20, 0  ;;  %v1020_v42 = vld [vmem:[#allocation7 + $0xb8] sm:$0xf0] }
  0x2d   :  { %308 = vmatpush.bf16.msra.mxu1 %v819_v51  ;;  %v151_v22 = vperm.slane %v1353_v19, 0  ;;  %v858_v41 = vld [vmem:[#allocation7 + $0xb0] sm:$0xf]  ;;  %v1017_v45 = vld [vmem:[#allocation7 + $0xa0] sm:$0xf0] }
  0x2e   :  { %v859_v44 = vor.u32 %v1020_v42, %v858_v41  ;;  %v834_v47 = vld [vmem:[#allocation7 + $0x80] sm:$0xf]  ;;  %v1014_v48 = vld [vmem:[#allocation7 + $0x88] sm:$0xf0]  ;;  %v1035_v49 = vld [vmem:[#allocation8 + $0x74] sm:$0xf] }
  0x2f   :  { %296 = vmatpush.bf16.msra.mxu0 %v791_v43  ;;  %v846_v43 = vld [vmem:[#allocation7 + $0x98] sm:$0xf]  ;;  %v924_v50 = vld [vmem:[#allocation8 + $0x78] sm:$0xf0]  ;;  %v916_v53 = vld [vmem:[#allocation8 + $0x68] sm:$0xf0]  ;;  %v835_v54 = vor.u32 %v1014_v48, %v834_v47 }
  0x30   :  { %446 = vmatpush.bf16.msra.mxu3 %v883_v46  ;;  %319 = vmatpush.bf16.msra.mxu2 %v859_v44  ;;  %v847_v46 = vor.u32 %v1017_v45, %v846_v43  ;;  %v927_v51 = vor.u32 %v1035_v49, %v924_v50  ;;  %v1011_v57 = vld [vmem:[#allocation7 + $0x70] sm:$0xf0]  ;;  %v908_v59 = vld [vmem:[#allocation8 + $0x58] sm:$0xf0]  ;;  %v1005_v7 = vld [vmem:[#allocation7 + $0x40] sm:$0xf0] }
  0x31   :  { %309 = vmatpush.bf16.msra.mxu1 %v807_v60  ;;  %v1031_v58 = vld [vmem:[#allocation8 + $0x54] sm:$0xf]  ;;  %v1052_v42 = vld [vmem:[%s1422_s6 + $0x38] sm:$0xff]  ;;  %v1051_v44 = vld [vmem:[%s1422_s6 + $0x30] sm:$0xff] }
  0x32   :  { %v911_v62 = vor.u32 %v1031_v58, %v908_v59  ;;  %v1048_v58 = vld [vmem:[%s1422_s6 + $0x18] sm:$0xff]  ;;  %v1047_v59 = vld [vmem:[%s1422_s6 + $0x10] sm:$0xff] }
  0x33   :  { %297 = vmatpush.bf16.msra.mxu0 %v779_v52  ;;  %v1033_v52 = vld [vmem:[#allocation8 + $0x64] sm:$0xf] }
  0x34   :  { %447 = vmatpush.bf16.msra.mxu3 %v875_v55  ;;  %320 = vmatpush.bf16.msra.mxu2 %v847_v46  ;;  %v822_v55 = vld [vmem:[#allocation7 + $0x68] sm:$0xf]  ;;  %v919_v56 = vor.u32 %v1033_v52, %v916_v53 }
  0x35   :  { %310 = vmatpush.bf16.msra.mxu1 %v795_v2  ;;  %v1008_v2 = vld [vmem:[#allocation7 + $0x58] sm:$0xf0] }
  0x37   :  { %298 = vmatpush.bf16.msra.mxu0 %v767_v61  ;;  %v823_v61 = vor.u32 %v1011_v57, %v822_v55  ;;  %v1049_v57 = vld [vmem:[%s1422_s6 + $0x20] sm:$0xff] }
  0x38   :  { %448 = vmatpush.bf16.msra.mxu3 %v867_v0  ;;  %321 = vmatpush.bf16.msra.mxu2 %v835_v54  ;;  %v810_v0 = vld [vmem:[#allocation7 + $0x50] sm:$0xf] }
  0x39   :  { %311 = vmatpush.bf16.msra.mxu1 %v783_v6  ;;  %v811_v5 = vor.u32 %v1008_v2, %v810_v0  ;;  %v798_v6 = vld [vmem:[#allocation7 + $0x38] sm:$0xf] }
  0x3a   :  { %299 = vmatmul.bf16.vlgmr.msra.gmra.mxu0 %v1319_v1 }
  0x3b   :  { %449 = vmatmul.bf16.vlgmr.msra.gmra.mxu3 %v1321_v3  ;;  %455 = vmatpush.bf16.msrb.mxu0 %v927_v51 }
  0x3c   :  { %322 = vmatpush.bf16.msra.mxu2 %v823_v61  ;;  %671 = vmatpush.bf16.msrb.mxu3 %v1052_v42  ;;  %v1045_v61 = vld [vmem:[%s1422_s6] sm:$0xff] }
  0x3d   :  { %312 = vmatpush.bf16.msra.mxu1 %v771_v9  ;;  %v799_v9 = vor.u32 %v1005_v7, %v798_v6 }
  0x3f   :  { %456 = vmatpush.bf16.msrb.mxu0 %v919_v56  ;;  %v1050_v56 = vld [vmem:[%s1422_s6 + $0x28] sm:$0xff] }
  0x40   :  { %313 = vmatmul.bf16.vlgmr.msra.gmra.mxu1 %v1319_v1  ;;  %323 = vmatpush.bf16.msra.mxu2 %v811_v5 }
  0x41   :  { %536 = vmatpush.bf16.msrb.mxu1 %v1044_v10  ;;  %672 = vmatpush.bf16.msrb.mxu3 %v1051_v44 }
  0x43   :  { %457 = vmatpush.bf16.msrb.mxu0 %v911_v62 }
  0x44   :  { %324 = vmatpush.bf16.msra.mxu2 %v799_v9 }
  0x45   :  { %537 = vmatpush.bf16.msrb.mxu1 %v1043_v11  ;;  %v786_v11 = vld [vmem:[#allocation7 + $0x20] sm:$0xf]  ;;  %673 = vmatpush.bf16.msrb.mxu3 %v1050_v56 }
  0x49   :  { %538 = vmatpush.bf16.msrb.mxu1 %v1042_v12  ;;  %v1002_v12 = vld [vmem:[#allocation7 + $0x28] sm:$0xf0]  ;;  %674 = vmatpush.bf16.msrb.mxu3 %v1049_v57 }
  0x4d   :  { %539 = vmatpush.bf16.msrb.mxu1 %v1041_v13  ;;  %675 = vmatpush.bf16.msrb.mxu3 %v1048_v58 }
  0x51   :  { %540 = vmatpush.bf16.msrb.mxu1 %v1040_v14  ;;  %676 = vmatpush.bf16.msrb.mxu3 %v1047_v59 }
  0x55   :  { %541 = vmatpush.bf16.msrb.mxu1 %v1039_v15 }
  0x59   :  { %542 = vmatpush.bf16.msrb.mxu1 %v1038_v16  ;;  %v787_v16 = vor.u32 %v1002_v12, %v786_v11  ;;  %v152_v12 = vperm.slane %v1353_v19, 1 }
  0x5b   :  { %325 = vmatpush.bf16.msra.mxu2 %v787_v16 }
  0x5d   :  { %543 = vmatpush.bf16.msrb.mxu1 %v1037_v17  ;;  %v774_v17 = vld [vmem:[#allocation7 + $0x8] sm:$0xf] }
  0xb7   :  { %v300_v18 = vpop.f32.mrf.mxu0 }
  0xb8   :  { %v301_v25 = vadd.f32 %v300_v18, %v151_v22  ;;  %v999_v18 = vld [vmem:[#allocation7 + $0x10] sm:$0xf0] }
  0xbd   :  { %v1359_v33 = vpop.f32.mrf.mxu1 }
  0xbe   :  { %v450_v21 = vpop.f32.mrf.mxu3 }
  0xbf   :  { %v302_v24 = vpop.f32.mrf.mxu0  ;;  %v451_v26 = vadd.f32 %v450_v21, %v351_v23  ;;  %v775_v21 = vor.u32 %v999_v18, %v774_v17 }
  0xc0   :  { %v303_v28 = vadd.f32 %v302_v24, %v151_v22  ;;  %v1029_v24 = vld [vmem:[#allocation8 + $0x44] sm:$0xf] }
  0xc1   :  { %v469_v30 = vmul.f32 %v451_v26, %v301_v25  ;;  %326 = vmatpush.bf16.msra.mxu2 %v775_v21  ;;  %v900_v25 = vld [vmem:[#allocation8 + $0x48] sm:$0xf0] }
  0xc2   :  { %v903_v26 = vor.u32 %v1029_v24, %v900_v25 }
  0xc4   :  { %327 = vmatmul.bf16.vlgmr.msra.gmra.mxu2 %v1319_v1  ;;  %458 = vmatpush.bf16.msrb.mxu0 %v903_v26  ;;  %v582_v1 = vld [vmem:[%s1425_s9] sm:$0x3] }
  0xc5   :  { %v1361_v34 = vpop.f32.mrf.mxu1  ;;  %v588_v41 = vsel %vm586_vm1, %v582_v1, 0 }
  0xc6   :  { %v452_v27 = vpop.f32.mrf.mxu3  ;;  %597 = vmatpush.bf16.msrb.mxu2 %v588_v41  ;;  %v317_v18 = vadd.f32 %v1361_v34, %v152_v12 }
  0xc7   :  { %v453_v29 = vadd.f32 %v452_v27, %v351_v23  ;;  %v1027_v27 = vld [vmem:[#allocation8 + $0x34] sm:$0xf] }
  0xc9   :  { %v470_v31 = vmul.f32 %v453_v29, %v303_v28  ;;  %v892_v28 = vld [vmem:[#allocation8 + $0x38] sm:$0xf0] }
  0xca   :  { %v895_v29 = vor.u32 %v1027_v27, %v892_v28 }
  0xcb   :  { %v471_v32 = vpack.c.bf16 %v470_v31, %v469_v30  ;;  %v1025_v30 = vld [vmem:[#allocation8 + $0x24] sm:$0xf]  ;;  %v884_v31 = vld [vmem:[#allocation8 + $0x28] sm:$0xf0] }
  0xcc   :  { %459 = vmatpush.bf16.msrb.mxu0 %v895_v29 }
  0xcd   :  { %544 = vmatmul.bf16.vlgmr.msrb.gmra.mxu1 %v471_v32  ;;  %v887_v32 = vor.u32 %v1025_v30, %v884_v31  ;;  %v153_v30 = vperm.slane %v1353_v19, 2 }
  0xd0   :  { %460 = vmatpush.bf16.msrb.mxu0 %v887_v32 }
 0x147   :  { %v328_v62 = vpop.f32.mrf.mxu2 }
 0x14a   :  { %v545_v35 = vpop.f32.mrf.mxu1 }
 0x14b   :  { %v550_v36 = vmul.f32 0.35355338, %v545_v35  ;;  %v1023_v35 = vld [vmem:[#allocation8 + $0x14] sm:$0xf] }
 0x14d   :  { %v553_v37 = vsel %vm552_vm0, %v550_v36, -inf }
 0x14e   :  { %554 = vmax.xlane.f32.xlu0 %v553_v37 }
 0x152   :  { %v547_v38 = vpop.f32.mrf.mxu1 }
 0x153   :  { %v551_v39 = vmul.f32 0.35355338, %v547_v38  ;;  %v1021_v38 = vld [vmem:[#allocation8 + $0x4] sm:$0xf] }
 0x155   :  { %v556_v40 = vsel %vm552_vm0, %v551_v39, -inf }
 0x156   :  { %557 = vmax.xlane.f32.xlu0 %v556_v40 }
 0x1c1   :  { %v555_v60 = vpop.xlane.xlu0 %554 }
 0x1c2   :  { %v559_v63 = vsub.f32 %v550_v36, %v555_v60  ;;  %v876_v36 = vld [vmem:[#allocation8 + $0x18] sm:$0xf0] }
 0x1c3   :  { %v879_v37 = vor.u32 %v1023_v35, %v876_v36  ;;  %v1046_v60 = vld [vmem:[%s1422_s6 + $0x8] sm:$0xff]  ;;  %v329_v36 = vadd.f32 %v328_v62, %v153_v30 }
 0x1c4   :  { %v561_v4 = vmul.f32 1.442695, %v559_v63  ;;  %677 = vmatpush.bf16.msrb.mxu3 %v1046_v60  ;;  %v330_v63 = vpop.f32.mrf.mxu2 }
 0x1c5   :  { %461 = vmatpush.bf16.msrb.mxu0 %v879_v37 }
 0x1c6   :  { %1066 = vpow2.f32 %v561_v4  ;;  %v352_v4 = vperm.slane %v1355_v20, 1 }
 0x1c8   :  { %678 = vmatpush.bf16.msrb.mxu3 %v1045_v61 }
 0x1c9   :  { %v558_v8 = vpop.xlane.xlu0 %557 }
 0x1ca   :  { %v560_v10 = vsub.f32 %v551_v39, %v558_v8  ;;  %v868_v39 = vld [vmem:[#allocation8 + $0x8] sm:$0xf0] }
 0x1cb   :  { %v871_v40 = vor.u32 %v1021_v38, %v868_v39 }
 0x1cc   :  { %v1067_v13 = vpop.eup %1066  ;;  %v563_v14 = vmul.f32 1.442695, %v560_v10 }
 0x1cd   :  { %v565_v15 = vsel %vm552_vm0, %v1067_v13, 0.0  ;;  %462 = vmatpush.bf16.msrb.mxu0 %v871_v40 }
 0x1ce   :  { %1068 = vpow2.f32 %v563_v14  ;;  %566 = vadd.xlane.f32.xlu1 %v565_v15  ;;  %v1065_v14 = vld [vmem:[%s1423_s7] ss:$0 sm:$0xff]  ;;  %s1245_s7 = smov [#allocation11]  }
 0x1cf   :  { %s743_s30 = sshll.u32 %s1245_s7, 4  ;;  %s744_s30 = int_to_ptr.vmem [resolvable:$true] %s743_s30 }
 0x1d0   :  { %463 = vmatmul.bf16.vlgmr.msrb.gmra.mxu0 %v1321_v3 }
 0x1d4   :  { %v1069_v22 = vpop.eup %1068 }
 0x1d5   :  { %v568_v23 = vsel %vm552_vm0, %v1069_v22, 0.0 }
 0x1d6   :  { %569 = vadd.xlane.f32.xlu1 %v568_v23 }
 0x241   :  { %v567_v43 = vpop.xlane.xlu1 %566 }
 0x242   :  { %1070 = vrcp.f32 %v567_v43 }
 0x248   :  { %v1071_v45 = vpop.eup %1070 }
 0x249   :  { %v570_v46 = vpop.xlane.xlu1 %569  ;;  %v573_v47 = vmul.f32 %v1071_v45, %v567_v43 }
 0x24a   :  { %1072 = vrcp.f32 %v570_v46 }
 0x24b   :  { %v575_v48 = vsub.f32 2.0, %v573_v47 }
 0x24d   :  { %v577_v50 = vmul.f32 %v1071_v45, %v575_v48  ;;  %v464_v0 = vpop.f32.mrf.mxu0  ;;  %v331_v48 = vadd.f32 %v330_v63, %v153_v30 }
 0x24e   :  { %v465_v6 = vadd.f32 %v464_v0, %v352_v4 }
 0x24f   :  { %v579_v53 = vmul.f32 %v1067_v13, %v577_v50  ;;  %v315_v13 = vadd.f32 %v1359_v33, %v152_v12 }
 0x250   :  { %v1073_v49 = vpop.eup %1072 }
 0x251   :  { %v574_v3 = vmul.f32 %v1073_v49, %v570_v46 }
 0x253   :  { %v576_v51 = vsub.f32 2.0, %v574_v3 }
 0x255   :  { %v578_v52 = vmul.f32 %v1073_v49, %v576_v51  ;;  %v466_v5 = vpop.f32.mrf.mxu0 }
 0x256   :  { %v467_v7 = vadd.f32 %v466_v5, %v352_v4 }
 0x257   :  { %v580_v54 = vmul.f32 %v1069_v22, %v578_v52 }
 0x259   :  { %v581_v55 = vpack.c.bf16 %v580_v54, %v579_v53 }
 0x25b   :  { %960 = vmatmul.msk.bf16.vlgmr.msrb.gmra.mxu2 %vm552_vm0, %v581_v55 }
 0x2de   :  { %v599_v2 = vpop.f32.mrf.mxu2 }
 0x2df   :  { %v604_v9 = vmul.f32 %v599_v2, %v465_v6 }
 0x2e1   :  { %v731_v40 = vsub.f32 %v329_v36, %v604_v9 }
 0x2e6   :  { %v601_v8 = vpop.f32.mrf.mxu2 }
 0x2e7   :  { %v1398_v10 = vmul.f32 %v601_v8, %v467_v7 }
 0x2e9   :  { %v606_v11 = vpack.c.bf16 %v1398_v10, %v604_v9  ;;  %v732_v50 = vsub.f32 %v331_v48, %v1398_v10 }
 0x2eb   :  { %679 = vmatmul.bf16.vlgmr.msrb.gmra.mxu3 %v606_v11 }
 0x36e   :  { %v680_v15 = vpop.f32.mrf.mxu3 }
 0x36f   :  { %v685_v20 = vadd.f32 %v680_v15, %v315_v13 }
 0x371   :  { %v691_v16 = vadd.f32 %v1065_v14, %v685_v20 }
 0x373   :  { %v993_v17 = vmul.f32 -1.442695, %v691_v16 }
 0x375   :  { %1074 = vpow2.f32 %v993_v17 }
 0x376   :  { %v682_v21 = vpop.f32.mrf.mxu3 }
 0x377   :  { %v686_v22 = vadd.f32 %v682_v21, %v317_v18 }
 0x379   :  { %v692_v23 = vadd.f32 %v1065_v14, %v686_v22 }
 0x37b   :  { %v1075_v24 = vpop.eup %1074  ;;  %v994_v25 = vmul.f32 -1.442695, %v692_v23 }
 0x37c   :  { %v699_v26 = vadd.f32 1.0, %v1075_v24 }
 0x37d   :  { %1076 = vpow2.f32 %v994_v25 }
 0x37e   :  { %1078 = vrcp.f32 %v699_v26  ;;  %v712_v32 = vand.u32 2147483648, %v699_v26  ;;  %v710_v34 = vand.u32 2147483647, %v699_v26  ;;  %vm706_vm3 = vweird.f32 %v699_v26 }
 0x380   :  { %v713_v39 = vor.u32 1.1754944e-38, %v712_v32  ;;  %vm711_vm5 = vcmp.eq.f32.partialorder %v710_v34, 8.507059e+37 }
 0x383   :  { %v1077_v33 = vpop.eup %1076 }
 0x384   :  { %v1079_v27 = vpop.eup %1078  ;;  %v700_v28 = vadd.f32 1.0, %v1077_v33 }
 0x385   :  { %v702_v29 = vmul.f32 %v1079_v27, %v699_v26  ;;  %vm707_vm2 = vweird.f32 %v1079_v27 }
 0x386   :  { %1080 = vrcp.f32 %v700_v28  ;;  %vm708_vm4 = vmor %vm706_vm3, %vm707_vm2  ;;  %v727_v45 = vand.u32 2147483648, %v700_v28  ;;  %v725_v46 = vand.u32 2147483647, %v700_v28  ;;  %vm721_vm7 = vweird.f32 %v700_v28 }
 0x387   :  { %v703_v31 = vsub.f32 1.0, %v702_v29 }
 0x388   :  { %v728_v3 = vor.u32 1.1754944e-38, %v727_v45  ;;  %vm726_vm9 = vcmp.eq.f32.partialorder %v725_v46, 8.507059e+37 }
 0x389   :  { %v704_v35 = vmul.f32 %v1079_v27, %v703_v31 }
 0x38b   :  { %v705_v37 = vadd.f32 %v1079_v27, %v704_v35 }
 0x38c   :  { %v1081_v38 = vpop.eup %1080 }
 0x38d   :  { %v717_v1 = vmul.f32 %v1081_v38, %v700_v28  ;;  %v709_v41 = vsel %vm708_vm4, %v1079_v27, %v705_v37  ;;  %vm722_vm6 = vweird.f32 %v1081_v38 }
 0x38e   :  { %v714_v42 = vsel %vm711_vm5, %v713_v39, %v709_v41  ;;  %vm723_vm8 = vmor %vm721_vm7, %vm722_vm6 }
 0x38f   :  { %v718_v43 = vsub.f32 1.0, %v717_v1  ;;  %v733_v44 = vmul.f32 %v731_v40, %v714_v42 }
 0x391   :  { %v719_v19 = vmul.f32 %v1081_v38, %v718_v43  ;;  %v735_v47 = vadd.f32 %v733_v44, %v604_v9 }
 0x393   :  { %v720_v49 = vadd.f32 %v1081_v38, %v719_v19  ;;  %737 = vst [vmem:[#allocation11] sm:$0xff] %v735_v47 }
 0x395   :  { %v724_v51 = vsel %vm723_vm8, %v1081_v38, %v720_v49 }
 0x396   :  { %v729_v52 = vsel %vm726_vm9, %v728_v3, %v724_v51 }
 0x397   :  { %v734_v53 = vmul.f32 %v732_v50, %v729_v52 }
 0x399   :  { %v736_v54 = vadd.f32 %v734_v53, %v1398_v10 }
 0x39b   :  { %738 = vst [vmem:[#allocation11 + $0x8] sm:$0xff] %v736_v54 }
 0x39c   :  { %751 = dma.vmem_to_hbm [thread:$0]  %s744_s30, 256, %s746_s13, [#allocation4], %s1238_s25, %s1238_s25, %s1239_s26  }
 0x39d   :  { %1232 = dma.done.wait [#allocation4], 256  }
 0x39e   :  { %1233 = vsyncadd [#allocation4], 4294967040 }
 0x39f   :  { %756 = vsyncpa [#allocation3], 1 }
 0x3a0   :  { %757 = vsyncpa [#allocation6], 1 }
 0x3a1   :  { %758 = vsyncpa [#allocation9], 1 }
 0x3a2   :  { %759 = vsyncpa [#allocation4], 1 }

// kernel: tpu_custom_call.1
= control target key start
LH: loop header
LB: loop body
LE: loop exit
PB: predicated region body
PF: predicated region fallthrough
CT: control target
= control target key end

     0   :  { %15 = vsyncpa [#allocation3], 0  ;;  %s1416_s0 = inlined_call_operand.hbm [shape: bf16[16,128], index: 0, kind: input, shape index: {}]   ;;  %s1417_s1 = inlined_call_operand.hbm [shape: bf16[16,128], index: 1, kind: input, shape index: {}]   ;;  %s1418_s2 = inlined_call_operand.hbm [shape: bf16[128,384], index: 2, kind: input, shape index: {}]   ;;  %s1419_s3 = inlined_call_operand.vmem [shape: f32[1,384], index: 3, kind: input, shape index: {}]   ;;  %s1420_s4 = inlined_call_operand.hbm [shape: bf16[128,256], index: 4, kind: input, shape index: {}]   ;;  %s1421_s5 = inlined_call_operand.hbm [shape: f32[1,256], index: 5, kind: input, shape index: {}]   ;;  %s1422_s6 = inlined_call_operand.vmem [shape: bf16[128,128], index: 6, kind: input, shape index: {}]   ;;  %s1423_s7 = inlined_call_operand.vmem [shape: f32[1,128], index: 7, kind: input, shape index: {}]   ;;  %s1424_s8 = inlined_call_operand.vmem [shape: bf16[128,4], index: 8, kind: input, shape index: {}]   ;;  %s1425_s9 = inlined_call_operand.vmem [shape: bf16[4,128], index: 9, kind: input, shape index: {}]   ;;  %s1426_s10 = inlined_call_operand.hbm [shape: f32[16,128], index: 10, kind: output, shape index: {}]  }
   0x1   :  { %16 = vsyncpa [#allocation6], 0 }
   0x2   :  { %17 = vsyncpa [#allocation9], 0 }
   0x3   :  { %18 = vsyncpa [#allocation4], 0  ;;  %s36_s15 = sshll.u32 %s1417_s1, 4  ;;  %s1234_s16 = smov [#allocation5]   ;;  %s37_s15 = int_to_ptr.hbm [resolvable:$true] %s36_s15 }
   0x4   :  { %s38_s17 = sshll.u32 %s1234_s16, 4  ;;  %s64_s20 = sshll.u32 %s1420_s4, 4  ;;  %s39_s17 = int_to_ptr.vmem [resolvable:$true] %s38_s17  ;;  %s65_s20 = int_to_ptr.hbm [resolvable:$true] %s64_s20 }
   0x5   :  { %s1235_s21 = smov 64   ;;  %s1236_s22 = smov 4  }
   0x6   :  { %44 = dma.hbm_to_vmem [thread:$0]  %s37_s15, 128, %s39_s17, [#allocation6], %s1235_s21, %s1235_s21, %s1236_s22  }
   0x7   :  { %s1237_s23 = smov [#allocation8]   ;;  %s1238_s25 = smov 128  }
   0x8   :  { %s66_s24 = sshll.u32 %s1237_s23, 4  ;;  %s1239_s26 = smov 8   ;;  %s67_s24 = int_to_ptr.vmem [resolvable:$true] %s66_s24 }
   0x9   :  { %72 = dma.hbm_to_vmem [thread:$0]  %s65_s20, 2048, %s67_s24, [#allocation9], %s1238_s25, %s1238_s25, %s1239_s26  }
   0xa   :  { %s23_s28 = sshll.u32 %s1416_s0, 4  ;;  %s1240_s29 = smov [#allocation2]   ;;  %s24_s28 = int_to_ptr.hbm [resolvable:$true] %s23_s28 }
   0xb   :  { %s25_s4 = sshll.u32 %s1240_s29, 4  ;;  %s49_s12 = sshll.u32 %s1418_s2, 4  ;;  %s26_s4 = int_to_ptr.vmem [resolvable:$true] %s25_s4  ;;  %s50_s12 = int_to_ptr.hbm [resolvable:$true] %s49_s12 }
   0xc   :  { %31 = dma.hbm_to_vmem [thread:$0]  %s24_s28, 128, %s26_s4, [#allocation3], %s1235_s21, %s1235_s21, %s1236_s22  }
   0xd   :  { %s1241_s13 = smov [#allocation7]   ;;  %s1242_s15 = smov 192  }
   0xe   :  { %s51_s14 = sshll.u32 %s1241_s13, 4  ;;  %s1243_s16 = smov 12   ;;  %s52_s14 = int_to_ptr.vmem [resolvable:$true] %s51_s14 }
   0xf   :  { %57 = dma.hbm_to_vmem [thread:$0]  %s50_s12, 3072, %s52_s14, [#allocation6], %s1242_s15, %s1242_s15, %s1243_s16  }
  0x10   :  { %s78_s0 = sshll.u32 %s1421_s5, 4  ;;  %s1244_s19 = smov [#allocation10]   ;;  %s79_s0 = int_to_ptr.hbm [resolvable:$true] %s78_s0 }
  0x11   :  { %s80_s20 = sshll.u32 %s1244_s19, 4  ;;  %s81_s20 = int_to_ptr.vmem [resolvable:$true] %s80_s20 }
  0x12   :  { %83 = dma.hbm_to_vmem [thread:$0]  %s79_s0, 32, %s81_s20, [#allocation9]  }
  0x13   :  { %1226 = dma.done.wait [#allocation3], 128  }
  0x14   :  { %1227 = vsyncadd [#allocation3], 4294967168 }
  0x15   :  { %1228 = dma.done.wait [#allocation6], 3200  }
  0x16   :  { %1229 = vsyncadd [#allocation6], 4294964096 }
  0x17   :  { %1230 = dma.done.wait [#allocation9], 2080  }
  0x18   :  { %1231 = vsyncadd [#allocation9], 4294965216  ;;  %v850_v0 = vld [vmem:[#allocation7 + $0xa8] sm:$0xf]  ;;  %v1019_v1 = vld [vmem:[#allocation7 + $0xb0] sm:$0xf0] }
  0x19   :  { %v922_v2 = vld [vmem:[#allocation8 + $0x70] sm:$0xf]  ;;  %v851_v3 = vor.u32 %v1019_v1, %v850_v0  ;;  %v1036_v4 = vld [vmem:[#allocation8 + $0x74] sm:$0xf0]  ;;  %v1016_v6 = vld [vmem:[#allocation7 + $0x98] sm:$0xf0] }
  0x1a   :  { %v838_v5 = vld [vmem:[#allocation7 + $0x90] sm:$0xf]  ;;  %v923_v7 = vor.u32 %v1036_v4, %v922_v2  ;;  %v914_v8 = vld [vmem:[#allocation8 + $0x60] sm:$0xf]  ;;  %v1034_v9 = vld [vmem:[#allocation8 + $0x64] sm:$0xf0] }
  0x1b   :  { %291 = vmatpush.bf16.msra.mxu0 %v851_v3  ;;  %v839_v10 = vor.u32 %v1016_v6, %v838_v5  ;;  %v915_v11 = vor.u32 %v1034_v9, %v914_v8  ;;  %v826_v12 = vld [vmem:[#allocation7 + $0x78] sm:$0xf]  ;;  %v1013_v13 = vld [vmem:[#allocation7 + $0x80] sm:$0xf0]  ;;  %v906_v14 = vld [vmem:[#allocation8 + $0x50] sm:$0xf] }
  0x1c   :  { %441 = vmatpush.bf16.msra.mxu3 %v923_v7  ;;  %v1032_v15 = vld [vmem:[#allocation8 + $0x54] sm:$0xf0]  ;;  %v827_v16 = vor.u32 %v1013_v13, %v826_v12  ;;  %v814_v18 = vld [vmem:[#allocation7 + $0x60] sm:$0xf]  ;;  %v1010_v19 = vld [vmem:[#allocation7 + $0x68] sm:$0xf0] }
  0x1d   :  { %v907_v17 = vor.u32 %v1032_v15, %v906_v14  ;;  %v898_v20 = vld [vmem:[#allocation8 + $0x40] sm:$0xf]  ;;  %v1030_v21 = vld [vmem:[#allocation8 + $0x44] sm:$0xf0]  ;;  %v815_v22 = vor.u32 %v1010_v19, %v814_v18  ;;  %v1018_v24 = vld [vmem:[#allocation7 + $0xac] sm:$0xf] }
  0x1e   :  { %v802_v23 = vld [vmem:[#allocation7 + $0x48] sm:$0xf]  ;;  %v852_v25 = vld [vmem:[#allocation7 + $0xb4] sm:$0xf0]  ;;  %v899_v26 = vor.u32 %v1030_v21, %v898_v20  ;;  %v1007_v27 = vld [vmem:[#allocation7 + $0x50] sm:$0xf0] }
  0x1f   :  { %292 = vmatpush.bf16.msra.mxu0 %v839_v10  ;;  %v855_v28 = vor.u32 %v1018_v24, %v852_v25  ;;  %v1015_v29 = vld [vmem:[#allocation7 + $0x94] sm:$0xf]  ;;  %v840_v30 = vld [vmem:[#allocation7 + $0x9c] sm:$0xf0]  ;;  %v890_v31 = vld [vmem:[#allocation8 + $0x30] sm:$0xf]  ;;  %v803_v34 = vor.u32 %v1007_v27, %v802_v23 }
  0x20   :  { %442 = vmatpush.bf16.msra.mxu3 %v915_v11  ;;  %v1028_v32 = vld [vmem:[#allocation8 + $0x34] sm:$0xf0]  ;;  %v843_v33 = vor.u32 %v1015_v29, %v840_v30  ;;  %v1012_v35 = vld [vmem:[#allocation7 + $0x7c] sm:$0xf]  ;;  %v828_v36 = vld [vmem:[#allocation7 + $0x84] sm:$0xf0] }
  0x21   :  { %305 = vmatpush.bf16.msra.mxu1 %v855_v28  ;;  %v891_v37 = vor.u32 %v1028_v32, %v890_v31  ;;  %v790_v38 = vld [vmem:[#allocation7 + $0x30] sm:$0xf]  ;;  %v1004_v39 = vld [vmem:[#allocation7 + $0x38] sm:$0xf0]  ;;  %v882_v40 = vld [vmem:[#allocation8 + $0x20] sm:$0xf]  ;;  %v831_v42 = vor.u32 %v1012_v35, %v828_v36 }
  0x22   :  { %v1026_v41 = vld [vmem:[#allocation8 + $0x24] sm:$0xf0]  ;;  %v791_v43 = vor.u32 %v1004_v39, %v790_v38  ;;  %v1009_v44 = vld [vmem:[#allocation7 + $0x64] sm:$0xf]  ;;  %v816_v45 = vld [vmem:[#allocation7 + $0x6c] sm:$0xf0] }
  0x23   :  { %293 = vmatpush.bf16.msra.mxu0 %v827_v16  ;;  %v883_v46 = vor.u32 %v1026_v41, %v882_v40  ;;  %v778_v47 = vld [vmem:[#allocation7 + $0x18] sm:$0xf]  ;;  %v1001_v48 = vld [vmem:[#allocation7 + $0x20] sm:$0xf0]  ;;  %v874_v49 = vld [vmem:[#allocation8 + $0x10] sm:$0xf]  ;;  %v819_v51 = vor.u32 %v1009_v44, %v816_v45 }
  0x24   :  { %443 = vmatpush.bf16.msra.mxu3 %v907_v17  ;;  %v1024_v50 = vld [vmem:[#allocation8 + $0x14] sm:$0xf0]  ;;  %v779_v52 = vor.u32 %v1001_v48, %v778_v47  ;;  %v1006_v53 = vld [vmem:[#allocation7 + $0x4c] sm:$0xf]  ;;  %v766_v56 = vld [vmem:[#allocation7] sm:$0xf] }
  0x25   :  { %306 = vmatpush.bf16.msra.mxu1 %v843_v33  ;;  %v804_v54 = vld [vmem:[#allocation7 + $0x54] sm:$0xf0]  ;;  %v875_v55 = vor.u32 %v1024_v50, %v874_v49  ;;  %v998_v57 = vld [vmem:[#allocation7 + $0x8] sm:$0xf0]  ;;  %v866_v58 = vld [vmem:[#allocation8] sm:$0xf] }
  0x26   :  { %v1022_v59 = vld [vmem:[#allocation8 + $0x4] sm:$0xf0]  ;;  %v807_v60 = vor.u32 %v1006_v53, %v804_v54  ;;  %v767_v61 = vor.u32 %v998_v57, %v766_v56  ;;  %v1003_v62 = vld [vmem:[#allocation7 + $0x34] sm:$0xf]  ;;  %v792_v63 = vld [vmem:[#allocation7 + $0x3c] sm:$0xf0] }
  0x27   :  { %294 = vmatpush.bf16.msra.mxu0 %v815_v22  ;;  %v867_v0 = vor.u32 %v1022_v59, %v866_v58  ;;  %v1319_v1 = vld [vmem:[#allocation2] sm:$0xff]  ;;  %v795_v2 = vor.u32 %v1003_v62, %v792_v63  ;;  %v1321_v3 = vld [vmem:[#allocation5] sm:$0xff]  ;;  %v780_v5 = vld [vmem:[#allocation7 + $0x24] sm:$0xf0]  ;;  %vm552_vm0 = vcmask 31744   ;;  %vm586_vm1 = vcmask 1041408  }
  0x28   :  { %444 = vmatpush.bf16.msra.mxu3 %v899_v26  ;;  %v1000_v4 = vld [vmem:[#allocation7 + $0x1c] sm:$0xf]  ;;  %v997_v7 = vld [vmem:[#allocation7 + $0x4] sm:$0xf]  ;;  %v768_v8 = vld [vmem:[#allocation7 + $0xc] sm:$0xf0] }
  0x29   :  { %307 = vmatpush.bf16.msra.mxu1 %v831_v42  ;;  %v783_v6 = vor.u32 %v1000_v4, %v780_v5  ;;  %v771_v9 = vor.u32 %v997_v7, %v768_v8  ;;  %v1044_v10 = vld [vmem:[%s1424_s8 + $0x38] sm:$0xff]  ;;  %v1043_v11 = vld [vmem:[%s1424_s8 + $0x30] sm:$0xff]  ;;  %v1042_v12 = vld [vmem:[%s1424_s8 + $0x28] sm:$0xff]  ;;  %s745_s13 = sshll.u32 %s1426_s10, 4  ;;  %s746_s13 = int_to_ptr.hbm [resolvable:$true] %s745_s13 }
  0x2a   :  { %v1041_v13 = vld [vmem:[%s1424_s8 + $0x20] sm:$0xff]  ;;  %v1040_v14 = vld [vmem:[%s1424_s8 + $0x18] sm:$0xff]  ;;  %v1039_v15 = vld [vmem:[%s1424_s8 + $0x10] sm:$0xff] }
  0x2b   :  { %295 = vmatpush.bf16.msra.mxu0 %v803_v34  ;;  %v1038_v16 = vld [vmem:[%s1424_s8 + $0x8] sm:$0xff]  ;;  %v1037_v17 = vld [vmem:[%s1424_s8] sm:$0xff]  ;;  %v1355_v20 = vld [vmem:[#allocation10] sm:$0x3] }
  0x2c   :  { %445 = vmatpush.bf16.msra.mxu3 %v891_v37  ;;  %v1353_v19 = vld [vmem:[%s1419_s3] sm:$0x7]  ;;  %v351_v23 = vperm.slane %v1355_v20, 0  ;;  %v1020_v42 = vld [vmem:[#allocation7 + $0xb8] sm:$0xf0] }
  0x2d   :  { %308 = vmatpush.bf16.msra.mxu1 %v819_v51  ;;  %v151_v22 = vperm.slane %v1353_v19, 0  ;;  %v858_v41 = vld [vmem:[#allocation7 + $0xb0] sm:$0xf]  ;;  %v1017_v45 = vld [vmem:[#allocation7 + $0xa0] sm:$0xf0] }
  0x2e   :  { %v859_v44 = vor.u32 %v1020_v42, %v858_v41  ;;  %v834_v47 = vld [vmem:[#allocation7 + $0x80] sm:$0xf]  ;;  %v1014_v48 = vld [vmem:[#allocation7 + $0x88] sm:$0xf0]  ;;  %v1035_v49 = vld [vmem:[#allocation8 + $0x74] sm:$0xf] }
  0x2f   :  { %296 = vmatpush.bf16.msra.mxu0 %v791_v43  ;;  %v846_v43 = vld [vmem:[#allocation7 + $0x98] sm:$0xf]  ;;  %v924_v50 = vld [vmem:[#allocation8 + $0x78] sm:$0xf0]  ;;  %v916_v53 = vld [vmem:[#allocation8 + $0x68] sm:$0xf0]  ;;  %v835_v54 = vor.u32 %v1014_v48, %v834_v47 }
  0x30   :  { %446 = vmatpush.bf16.msra.mxu3 %v883_v46  ;;  %319 = vmatpush.bf16.msra.mxu2 %v859_v44  ;;  %v847_v46 = vor.u32 %v1017_v45, %v846_v43  ;;  %v927_v51 = vor.u32 %v1035_v49, %v924_v50  ;;  %v1011_v57 = vld [vmem:[#allocation7 + $0x70] sm:$0xf0]  ;;  %v908_v59 = vld [vmem:[#allocation8 + $0x58] sm:$0xf0]  ;;  %v1005_v7 = vld [vmem:[#allocation7 + $0x40] sm:$0xf0] }
  0x31   :  { %309 = vmatpush.bf16.msra.mxu1 %v807_v60  ;;  %v1031_v58 = vld [vmem:[#allocation8 + $0x54] sm:$0xf]  ;;  %v1052_v42 = vld [vmem:[%s1422_s6 + $0x38] sm:$0xff]  ;;  %v1051_v44 = vld [vmem:[%s1422_s6 + $0x30] sm:$0xff] }
  0x32   :  { %v911_v62 = vor.u32 %v1031_v58, %v908_v59  ;;  %v1048_v58 = vld [vmem:[%s1422_s6 + $0x18] sm:$0xff]  ;;  %v1047_v59 = vld [vmem:[%s1422_s6 + $0x10] sm:$0xff] }
  0x33   :  { %297 = vmatpush.bf16.msra.mxu0 %v779_v52  ;;  %v1033_v52 = vld [vmem:[#allocation8 + $0x64] sm:$0xf] }
  0x34   :  { %447 = vmatpush.bf16.msra.mxu3 %v875_v55  ;;  %320 = vmatpush.bf16.msra.mxu2 %v847_v46  ;;  %v822_v55 = vld [vmem:[#allocation7 + $0x68] sm:$0xf]  ;;  %v919_v56 = vor.u32 %v1033_v52, %v916_v53 }
  0x35   :  { %310 = vmatpush.bf16.msra.mxu1 %v795_v2  ;;  %v1008_v2 = vld [vmem:[#allocation7 + $0x58] sm:$0xf0] }
  0x37   :  { %298 = vmatpush.bf16.msra.mxu0 %v767_v61  ;;  %v823_v61 = vor.u32 %v1011_v57, %v822_v55  ;;  %v1049_v57 = vld [vmem:[%s1422_s6 + $0x20] sm:$0xff] }
  0x38   :  { %448 = vmatpush.bf16.msra.mxu3 %v867_v0  ;;  %321 = vmatpush.bf16.msra.mxu2 %v835_v54  ;;  %v810_v0 = vld [vmem:[#allocation7 + $0x50] sm:$0xf] }
  0x39   :  { %311 = vmatpush.bf16.msra.mxu1 %v783_v6  ;;  %v811_v5 = vor.u32 %v1008_v2, %v810_v0  ;;  %v798_v6 = vld [vmem:[#allocation7 + $0x38] sm:$0xf] }
  0x3a   :  { %299 = vmatmul.bf16.vlgmr.msra.gmra.mxu0 %v1319_v1 }
  0x3b   :  { %449 = vmatmul.bf16.vlgmr.msra.gmra.mxu3 %v1321_v3  ;;  %455 = vmatpush.bf16.msrb.mxu0 %v927_v51 }
  0x3c   :  { %322 = vmatpush.bf16.msra.mxu2 %v823_v61  ;;  %671 = vmatpush.bf16.msrb.mxu3 %v1052_v42  ;;  %v1045_v61 = vld [vmem:[%s1422_s6] sm:$0xff] }
  0x3d   :  { %312 = vmatpush.bf16.msra.mxu1 %v771_v9  ;;  %v799_v9 = vor.u32 %v1005_v7, %v798_v6 }
  0x3f   :  { %456 = vmatpush.bf16.msrb.mxu0 %v919_v56  ;;  %v1050_v56 = vld [vmem:[%s1422_s6 + $0x28] sm:$0xff] }
  0x40   :  { %313 = vmatmul.bf16.vlgmr.msra.gmra.mxu1 %v1319_v1  ;;  %323 = vmatpush.bf16.msra.mxu2 %v811_v5 }
  0x41   :  { %536 = vmatpush.bf16.msrb.mxu1 %v1044_v10  ;;  %672 = vmatpush.bf16.msrb.mxu3 %v1051_v44 }
  0x43   :  { %457 = vmatpush.bf16.msrb.mxu0 %v911_v62 }
  0x44   :  { %324 = vmatpush.bf16.msra.mxu2 %v799_v9 }
  0x45   :  { %537 = vmatpush.bf16.msrb.mxu1 %v1043_v11  ;;  %v786_v11 = vld [vmem:[#allocation7 + $0x20] sm:$0xf]  ;;  %673 = vmatpush.bf16.msrb.mxu3 %v1050_v56 }
  0x49   :  { %538 = vmatpush.bf16.msrb.mxu1 %v1042_v12  ;;  %v1002_v12 = vld [vmem:[#allocation7 + $0x28] sm:$0xf0]  ;;  %674 = vmatpush.bf16.msrb.mxu3 %v1049_v57 }
  0x4d   :  { %539 = vmatpush.bf16.msrb.mxu1 %v1041_v13  ;;  %675 = vmatpush.bf16.msrb.mxu3 %v1048_v58 }
  0x51   :  { %540 = vmatpush.bf16.msrb.mxu1 %v1040_v14  ;;  %676 = vmatpush.bf16.msrb.mxu3 %v1047_v59 }
  0x55   :  { %541 = vmatpush.bf16.msrb.mxu1 %v1039_v15 }
  0x59   :  { %542 = vmatpush.bf16.msrb.mxu1 %v1038_v16  ;;  %v787_v16 = vor.u32 %v1002_v12, %v786_v11  ;;  %v152_v12 = vperm.slane %v1353_v19, 1 }
  0x5b   :  { %325 = vmatpush.bf16.msra.mxu2 %v787_v16 }
  0x5d   :  { %543 = vmatpush.bf16.msrb.mxu1 %v1037_v17  ;;  %v774_v17 = vld [vmem:[#allocation7 + $0x8] sm:$0xf] }
  0xb7   :  { %v300_v18 = vpop.f32.mrf.mxu0 }
  0xb8   :  { %v301_v25 = vadd.f32 %v300_v18, %v151_v22  ;;  %v999_v18 = vld [vmem:[#allocation7 + $0x10] sm:$0xf0] }
  0xbd   :  { %v1359_v33 = vpop.f32.mrf.mxu1 }
  0xbe   :  { %v450_v21 = vpop.f32.mrf.mxu3 }
  0xbf   :  { %v302_v24 = vpop.f32.mrf.mxu0  ;;  %v451_v26 = vadd.f32 %v450_v21, %v351_v23  ;;  %v775_v21 = vor.u32 %v999_v18, %v774_v17 }
  0xc0   :  { %v303_v28 = vadd.f32 %v302_v24, %v151_v22  ;;  %v1029_v24 = vld [vmem:[#allocation8 + $0x44] sm:$0xf] }
  0xc1   :  { %v469_v30 = vmul.f32 %v451_v26, %v301_v25  ;;  %326 = vmatpush.bf16.msra.mxu2 %v775_v21  ;;  %v900_v25 = vld [vmem:[#allocation8 + $0x48] sm:$0xf0] }
  0xc2   :  { %v903_v26 = vor.u32 %v1029_v24, %v900_v25 }
  0xc4   :  { %327 = vmatmul.bf16.vlgmr.msra.gmra.mxu2 %v1319_v1  ;;  %458 = vmatpush.bf16.msrb.mxu0 %v903_v26  ;;  %v582_v1 = vld [vmem:[%s1425_s9] sm:$0x3] }
  0xc5   :  { %v1361_v34 = vpop.f32.mrf.mxu1  ;;  %v588_v41 = vsel %vm586_vm1, %v582_v1, 0 }
  0xc6   :  { %v452_v27 = vpop.f32.mrf.mxu3  ;;  %597 = vmatpush.bf16.msrb.mxu2 %v588_v41  ;;  %v317_v18 = vadd.f32 %v1361_v34, %v152_v12 }
  0xc7   :  { %v453_v29 = vadd.f32 %v452_v27, %v351_v23  ;;  %v1027_v27 = vld [vmem:[#allocation8 + $0x34] sm:$0xf] }
  0xc9   :  { %v470_v31 = vmul.f32 %v453_v29, %v303_v28  ;;  %v892_v28 = vld [vmem:[#allocation8 + $0x38] sm:$0xf0] }
  0xca   :  { %v895_v29 = vor.u32 %v1027_v27, %v892_v28 }
  0xcb   :  { %v471_v32 = vpack.c.bf16 %v470_v31, %v469_v30  ;;  %v1025_v30 = vld [vmem:[#allocation8 + $0x24] sm:$0xf]  ;;  %v884_v31 = vld [vmem:[#allocation8 + $0x28] sm:$0xf0] }
  0xcc   :  { %459 = vmatpush.bf16.msrb.mxu0 %v895_v29 }
  0xcd   :  { %544 = vmatmul.bf16.vlgmr.msrb.gmra.mxu1 %v471_v32  ;;  %v887_v32 = vor.u32 %v1025_v30, %v884_v31  ;;  %v153_v30 = vperm.slane %v1353_v19, 2 }
  0xd0   :  { %460 = vmatpush.bf16.msrb.mxu0 %v887_v32 }
 0x147   :  { %v328_v62 = vpop.f32.mrf.mxu2 }
 0x14a   :  { %v545_v35 = vpop.f32.mrf.mxu1 }
 0x14b   :  { %v550_v36 = vmul.f32 0.35355338, %v545_v35  ;;  %v1023_v35 = vld [vmem:[#allocation8 + $0x14] sm:$0xf] }
 0x14d   :  { %v553_v37 = vsel %vm552_vm0, %v550_v36, -inf }
 0x14e   :  { %554 = vmax.xlane.f32.xlu0 %v553_v37 }
 0x152   :  { %v547_v38 = vpop.f32.mrf.mxu1 }
 0x153   :  { %v551_v39 = vmul.f32 0.35355338, %v547_v38  ;;  %v1021_v38 = vld [vmem:[#allocation8 + $0x4] sm:$0xf] }
 0x155   :  { %v556_v40 = vsel %vm552_vm0, %v551_v39, -inf }
 0x156   :  { %557 = vmax.xlane.f32.xlu0 %v556_v40 }
 0x1c1   :  { %v555_v60 = vpop.xlane.xlu0 %554 }
 0x1c2   :  { %v559_v63 = vsub.f32 %v550_v36, %v555_v60  ;;  %v876_v36 = vld [vmem:[#allocation8 + $0x18] sm:$0xf0] }
 0x1c3   :  { %v879_v37 = vor.u32 %v1023_v35, %v876_v36  ;;  %v1046_v60 = vld [vmem:[%s1422_s6 + $0x8] sm:$0xff]  ;;  %v329_v36 = vadd.f32 %v328_v62, %v153_v30 }
 0x1c4   :  { %v561_v4 = vmul.f32 1.442695, %v559_v63  ;;  %677 = vmatpush.bf16.msrb.mxu3 %v1046_v60  ;;  %v330_v63 = vpop.f32.mrf.mxu2 }
 0x1c5   :  { %461 = vmatpush.bf16.msrb.mxu0 %v879_v37 }
 0x1c6   :  { %1066 = vpow2.f32 %v561_v4  ;;  %v352_v4 = vperm.slane %v1355_v20, 1 }
 0x1c8   :  { %678 = vmatpush.bf16.msrb.mxu3 %v1045_v61 }
 0x1c9   :  { %v558_v8 = vpop.xlane.xlu0 %557 }
 0x1ca   :  { %v560_v10 = vsub.f32 %v551_v39, %v558_v8  ;;  %v868_v39 = vld [vmem:[#allocation8 + $0x8] sm:$0xf0] }
 0x1cb   :  { %v871_v40 = vor.u32 %v1021_v38, %v868_v39 }
 0x1cc   :  { %v1067_v13 = vpop.eup %1066  ;;  %v563_v14 = vmul.f32 1.442695, %v560_v10 }
 0x1cd   :  { %v565_v15 = vsel %vm552_vm0, %v1067_v13, 0.0  ;;  %462 = vmatpush.bf16.msrb.mxu0 %v871_v40 }
 0x1ce   :  { %1068 = vpow2.f32 %v563_v14  ;;  %566 = vadd.xlane.f32.xlu1 %v565_v15  ;;  %v1065_v14 = vld [vmem:[%s1423_s7] ss:$0 sm:$0xff]  ;;  %s1245_s7 = smov [#allocation11]  }
 0x1cf   :  { %s743_s30 = sshll.u32 %s1245_s7, 4  ;;  %s744_s30 = int_to_ptr.vmem [resolvable:$true] %s743_s30 }
 0x1d0   :  { %463 = vmatmul.bf16.vlgmr.msrb.gmra.mxu0 %v1321_v3 }
 0x1d4   :  { %v1069_v22 = vpop.eup %1068 }
 0x1d5   :  { %v568_v23 = vsel %vm552_vm0, %v1069_v22, 0.0 }
 0x1d6   :  { %569 = vadd.xlane.f32.xlu1 %v568_v23 }
 0x241   :  { %v567_v43 = vpop.xlane.xlu1 %566 }
 0x242   :  { %1070 = vrcp.f32 %v567_v43 }
 0x248   :  { %v1071_v45 = vpop.eup %1070 }
 0x249   :  { %v570_v46 = vpop.xlane.xlu1 %569  ;;  %v573_v47 = vmul.f32 %v1071_v45, %v567_v43 }
 0x24a   :  { %1072 = vrcp.f32 %v570_v46 }
 0x24b   :  { %v575_v48 = vsub.f32 2.0, %v573_v47 }
 0x24d   :  { %v577_v50 = vmul.f32 %v1071_v45, %v575_v48  ;;  %v464_v0 = vpop.f32.mrf.mxu0  ;;  %v331_v48 = vadd.f32 %v330_v63, %v153_v30 }
 0x24e   :  { %v465_v6 = vadd.f32 %v464_v0, %v352_v4 }
 0x24f   :  { %v579_v53 = vmul.f32 %v1067_v13, %v577_v50  ;;  %v315_v13 = vadd.f32 %v1359_v33, %v152_v12 }
 0x250   :  { %v1073_v49 = vpop.eup %1072 }
 0x251   :  { %v574_v3 = vmul.f32 %v1073_v49, %v570_v46 }
 0x253   :  { %v576_v51 = vsub.f32 2.0, %v574_v3 }
 0x255   :  { %v578_v52 = vmul.f32 %v1073_v49, %v576_v51  ;;  %v466_v5 = vpop.f32.mrf.mxu0 }
 0x256   :  { %v467_v7 = vadd.f32 %v466_v5, %v352_v4 }
 0x257   :  { %v580_v54 = vmul.f32 %v1069_v22, %v578_v52 }
 0x259   :  { %v581_v55 = vpack.c.bf16 %v580_v54, %v579_v53 }
 0x25b   :  { %960 = vmatmul.msk.bf16.vlgmr.msrb.gmra.mxu2 %vm552_vm0, %v581_v55 }
 0x2de   :  { %v599_v2 = vpop.f32.mrf.mxu2 }
 0x2df   :  { %v604_v9 = vmul.f32 %v599_v2, %v465_v6 }
 0x2e1   :  { %v731_v40 = vsub.f32 %v329_v36, %v604_v9 }
 0x2e6   :  { %v601_v8 = vpop.f32.mrf.mxu2 }
 0x2e7   :  { %v1398_v10 = vmul.f32 %v601_v8, %v467_v7 }
 0x2e9   :  { %v606_v11 = vpack.c.bf16 %v1398_v10, %v604_v9  ;;  %v732_v50 = vsub.f32 %v331_v48, %v1398_v10 }
 0x2eb   :  { %679 = vmatmul.bf16.vlgmr.msrb.gmra.mxu3 %v606_v11 }
 0x36e   :  { %v680_v15 = vpop.f32.mrf.mxu3 }
 0x36f   :  { %v685_v20 = vadd.f32 %v680_v15, %v315_v13 }
 0x371   :  { %v691_v16 = vadd.f32 %v1065_v14, %v685_v20 }
 0x373   :  { %v993_v17 = vmul.f32 -1.442695, %v691_v16 }
 0x375   :  { %1074 = vpow2.f32 %v993_v17 }
 0x376   :  { %v682_v21 = vpop.f32.mrf.mxu3 }
 0x377   :  { %v686_v22 = vadd.f32 %v682_v21, %v317_v18 }
 0x379   :  { %v692_v23 = vadd.f32 %v1065_v14, %v686_v22 }
 0x37b   :  { %v1075_v24 = vpop.eup %1074  ;;  %v994_v25 = vmul.f32 -1.442695, %v692_v23 }
 0x37c   :  { %v699_v26 = vadd.f32 1.0, %v1075_v24 }
 0x37d   :  { %1076 = vpow2.f32 %v994_v25 }
 0x37e   :  { %1078 = vrcp.f32 %v699_v26  ;;  %v712_v32 = vand.u32 2147483648, %v699_v26  ;;  %v710_v34 = vand.u32 2147483647, %v699_v26  ;;  %vm706_vm3 = vweird.f32 %v699_v26 }
 0x380   :  { %v713_v39 = vor.u32 1.1754944e-38, %v712_v32  ;;  %vm711_vm5 = vcmp.eq.f32.partialorder %v710_v34, 8.507059e+37 }
 0x383   :  { %v1077_v33 = vpop.eup %1076 }
 0x384   :  { %v1079_v27 = vpop.eup %1078  ;;  %v700_v28 = vadd.f32 1.0, %v1077_v33 }
 0x385   :  { %v702_v29 = vmul.f32 %v1079_v27, %v699_v26  ;;  %vm707_vm2 = vweird.f32 %v1079_v27 }
 0x386   :  { %1080 = vrcp.f32 %v700_v28  ;;  %vm708_vm4 = vmor %vm706_vm3, %vm707_vm2  ;;  %v727_v45 = vand.u32 2147483648, %v700_v28  ;;  %v725_v46 = vand.u32 2147483647, %v700_v28  ;;  %vm721_vm7 = vweird.f32 %v700_v28 }
 0x387   :  { %v703_v31 = vsub.f32 1.0, %v702_v29 }
 0x388   :  { %v728_v3 = vor.u32 1.1754944e-38, %v727_v45  ;;  %vm726_vm9 = vcmp.eq.f32.partialorder %v725_v46, 8.507059e+37 }
 0x389   :  { %v704_v35 = vmul.f32 %v1079_v27, %v703_v31 }
 0x38b   :  { %v705_v37 = vadd.f32 %v1079_v27, %v704_v35 }
 0x38c   :  { %v1081_v38 = vpop.eup %1080 }
 0x38d   :  { %v717_v1 = vmul.f32 %v1081_v38, %v700_v28  ;;  %v709_v41 = vsel %vm708_vm4, %v1079_v27, %v705_v37  ;;  %vm722_vm6 = vweird.f32 %v1081_v38 }
 0x38e   :  { %v714_v42 = vsel %vm711_vm5, %v713_v39, %v709_v41  ;;  %vm723_vm8 = vmor %vm721_vm7, %vm722_vm6 }
 0x38f   :  { %v718_v43 = vsub.f32 1.0, %v717_v1  ;;  %v733_v44 = vmul.f32 %v731_v40, %v714_v42 }
 0x391   :  { %v719_v19 = vmul.f32 %v1081_v38, %v718_v43  ;;  %v735_v47 = vadd.f32 %v733_v44, %v604_v9 }
 0x393   :  { %v720_v49 = vadd.f32 %v1081_v38, %v719_v19  ;;  %737 = vst [vmem:[#allocation11] sm:$0xff] %v735_v47 }
 0x395   :  { %v724_v51 = vsel %vm723_vm8, %v1081_v38, %v720_v49 }
 0x396   :  { %v729_v52 = vsel %vm726_vm9, %v728_v3, %v724_v51 }
 0x397   :  { %v734_v53 = vmul.f32 %v732_v50, %v729_v52 }
 0x399   :  { %v736_v54 = vadd.f32 %v734_v53, %v1398_v10 }
 0x39b   :  { %738 = vst [vmem:[#allocation11 + $0x8] sm:$0xff] %v736_v54 }
 0x39c   :  { %751 = dma.vmem_to_hbm [thread:$0]  %s744_s30, 256, %s746_s13, [#allocation4], %s1238_s25, %s1238_s25, %s1239_s26  }
 0x39d   :  { %1232 = dma.done.wait [#allocation4], 256  }
 0x39e   :  { %1233 = vsyncadd [#allocation4], 4294967040 }
 0x39f   :  { %756 = vsyncpa [#allocation3], 1 }
 0x3a0   :  { %757 = vsyncpa [#allocation6], 1 }
 0x3a1   :  { %758 = vsyncpa [#allocation9], 1 }
 0x3a2   :  { %759 = vsyncpa [#allocation4], 1 }

</bundles_post_ra>
